<compile_context>
chip_gen: v6e
topology: v6e:2x2x1
jax: 0.10.0
libtpu: 0.0.40
codegen_flags: <defaults>
</compile_context>

<pallas_src>
import functools
import math

import jax
import jax.numpy as jnp
from jax import lax
from jax.experimental import pallas as pl
from jax.experimental.pallas import tpu as pltpu


# ----------------------------- Pallas kernel --------------------------------

def bert_layer_kernel(*refs, num_heads: int, ln_eps: float,
                      use_self_cond: bool, has_skip: bool):
    f32, bf16 = jnp.float32, jnp.bfloat16

    out_ref = refs[-1]
    it = iter(refs[:-1])
    x_ref = next(it)
    skip_ref = next(it) if has_skip else None
    tproj_ref = next(it)
    if use_self_cond:
        sc_ref, wsc_ref, bsc_ref = next(it), next(it), next(it)
    mask_ref = next(it)
    wqkv_ref, bqkv_ref = next(it), next(it)
    wao_ref, bao_ref = next(it), next(it)
    ln1g_ref, ln1b_ref = next(it), next(it)
    wi_ref, bi_ref = next(it), next(it)
    wo_ref, bo_ref = next(it), next(it)
    ln2g_ref, ln2b_ref = next(it), next(it)

    # ---- input adds (f32): fused UNet skip + hoisted time projection ----
    x = x_ref[0].astype(f32)                       # (S, H)
    if has_skip:
        x = x + skip_ref[0].astype(f32)            # fused skip-connection add
    x = x + tproj_ref[0].astype(f32)               # (1, H) broadcast over S

    # ---- self-conditioning projection (bf16 MXU, f32 accumulate) ----
    if use_self_cond:
        sc = sc_ref[0].astype(bf16)                # (S, H)
        x = x + (jnp.dot(sc, wsc_ref[...], preferred_element_type=f32)
                 + bsc_ref[...].astype(f32))

    S, H = x.shape
    dh = H // num_heads
    scale = 1.0 / math.sqrt(dh)

    # ---- fused QKV projection ----
    x_bf = x.astype(bf16)
    qkv = (jnp.dot(x_bf, wqkv_ref[...], preferred_element_type=f32)
           + bqkv_ref[...].astype(f32))            # (S, 3H) f32
    q = (qkv[:, :H] * scale).astype(bf16)          # scale folded into q
    k = qkv[:, H:2 * H].astype(bf16)
    v = qkv[:, 2 * H:].astype(bf16)

    mask = mask_ref[0].astype(f32)                 # (1, S) additive key mask

    # ---- multi-head attention: no k transpose, no concat ----
    dn_qk = (((1,), (1,)), ((), ()))               # contract last axes of q and k
    attn = jnp.zeros((S, H), f32)
    for h in range(num_heads):                     # static unrolled loop
        lo = h * dh
        qh = q[:, lo:lo + dh]
        kh = k[:, lo:lo + dh]
        vh = v[:, lo:lo + dh]
        s = lax.dot_general(qh, kh, dn_qk, preferred_element_type=f32)  # (S, S)
        s = s + mask
        m = jnp.max(s, axis=-1, keepdims=True)
        p = jnp.exp(s - m)
        denom = jnp.sum(p, axis=-1, keepdims=True)
        p = p * pl.reciprocal(denom, approx=True)                       # EUP slot
        ctx = jnp.dot(p.astype(bf16), vh, preferred_element_type=f32)   # (S, dh)
        # accumulate attention output projection per head -> avoids concatenate
        attn = attn + jnp.dot(ctx.astype(bf16), wao_ref[lo:lo + dh, :],
                              preferred_element_type=f32)
    attn = attn + bao_ref[...].astype(f32)

    # ---- LayerNorm(attn + x)  (post-LN, f32 statistics) ----
    y = attn + x
    mu = jnp.mean(y, axis=-1, keepdims=True)
    var = jnp.mean((y - mu) ** 2, axis=-1, keepdims=True)
    y = (y - mu) * lax.rsqrt(var + ln_eps)
    y = y * ln1g_ref[...].astype(f32) + ln1b_ref[...].astype(f32)

    # ---- feed-forward (bf16 MXU, exact erf GELU in f32) ----
    hmid = (jnp.dot(y.astype(bf16), wi_ref[...], preferred_element_type=f32)
            + bi_ref[...].astype(f32))
    hmid = 0.5 * hmid * (1.0 + lax.erf(hmid * (1.0 / math.sqrt(2.0))))
    o = (jnp.dot(hmid.astype(bf16), wo_ref[...], preferred_element_type=f32)
         + bo_ref[...].astype(f32))

    # ---- LayerNorm(o + y) ----
    z = o + y
    mu2 = jnp.mean(z, axis=-1, keepdims=True)
    var2 = jnp.mean((z - mu2) ** 2, axis=-1, keepdims=True)
    z = (z - mu2) * lax.rsqrt(var2 + ln_eps)
    z = z * ln2g_ref[...].astype(f32) + ln2b_ref[...].astype(f32)

    out_ref[0] = z.astype(out_ref.dtype)


# ----------------------------- wrapper ---------------------------------------

def bert_layer(x, t_proj, self_cond, mask_add, lp, *, num_heads, use_self_cond,
               skip=None):
    """One transformer layer: (fused skip add) + time proj add + self-cond proj + BertBlock.

    Grid over batch ("parallel" -> shards over v7x's 2 TensorCores).  Weight / bias / LN
    blocks use constant index maps so the pipeline DMAs them once.
    # TODO(synk): for long sequences add flash-style KV tiling of the (S,S) scores.
    """
    B, S, H = x.shape
    has_skip = skip is not None

    kernel = functools.partial(
        bert_layer_kernel, num_heads=num_heads, ln_eps=1e-12,
        use_self_cond=use_self_cond, has_skip=has_skip)

    def batched(shape):
        return pl.BlockSpec(shape, lambda b: (b,) + (0,) * (len(shape) - 1))

    def const2d(arr):
        return pl.BlockSpec(arr.shape, lambda b: (0, 0))

    inputs, in_specs = [x], [batched((1, S, H))]
    if has_skip:
        inputs.append(skip)
        in_specs.append(batched((1, S, H)))
    inputs.append(t_proj)
    in_specs.append(batched((1, 1, H)))
    if use_self_cond:
        inputs += [self_cond, lp["wsc"], lp["bsc"]]
        in_specs += [batched((1, S, H)), const2d(lp["wsc"]), const2d(lp["bsc"])]
    inputs.append(mask_add)
    in_specs.append(batched((1, 1, S)))
    for name in ("wqkv", "bqkv", "wao", "bao", "ln1g", "ln1b",
                 "wi", "bi", "wo", "bo", "ln2g", "ln2b"):
        inputs.append(lp[name])
        in_specs.append(const2d(lp[name]))

    return pl.pallas_call(
        kernel,
        out_shape=jax.ShapeDtypeStruct((B, S, H), x.dtype),
        grid_spec=pltpu.PrefetchScalarGridSpec(
            num_scalar_prefetch=0,
            grid=(B,),
            in_specs=in_specs,
            out_specs=pl.BlockSpec((1, S, H), lambda b: (b, 0, 0)),
        ),
        compiler_params=pltpu.CompilerParams(
            dimension_semantics=("parallel",),          # batch is embarrassingly parallel
            vmem_limit_bytes=48 * 1024 * 1024,          # explicit, with v7x headroom
        ),
    )(*inputs)


def transformer_encoder_forward(x, emb_t, attention_mask, x_0_self_cond, params,
                                *, num_hidden_layers, num_heads, use_self_cond):
    """Faithful port of TransformerEncoder.forward (UNet-style skip connections)."""
    half = num_hidden_layers // 2
    B, _, H = emb_t.shape

    def time_proj(lp):
        # Hoisted out of the kernel: one batched (B,H)@(H,H) bf16 matmul per layer.
        t = jnp.dot(emb_t[:, 0, :].astype(jnp.bfloat16), lp["wt"],
                    preferred_element_type=jnp.float32) + lp["bt"]
        return t.reshape(B, 1, H)

    x_input_list = []
    # input blocks
    for i in range(half):
        x_input_list.append(x)
        x = bert_layer(x, time_proj(params[i]), x_0_self_cond, attention_mask,
                       params[i], num_heads=num_heads, use_self_cond=use_self_cond)
    # output blocks (UNet skip add fused into the layer kernel)
    for i in range(half):
        ind = i + half
        skip = x_input_list.pop()
        x = bert_layer(x, time_proj(params[ind]), x_0_self_cond, attention_mask,
                       params[ind], num_heads=num_heads, use_self_cond=use_self_cond,
                       skip=skip)
    return x


# ----------------------------- parameter init --------------------------------

def init_params(key, num_layers, hidden, intermediate):
    """Deterministic synthetic parameters.
    Matmul weights are bf16, stored (in, out) (transposed vs torch.nn.Linear.weight);
    Q/K/V are fused into one (H, 3H) weight.  Biases / LayerNorm params stay f32."""
    params = []
    for _ in range(num_layers):
        keys = jax.random.split(key, 7)
        key = keys[0]

        def w(k, shape, scale=0.02):
            return (scale * jax.random.normal(k, shape, dtype=jnp.float32)
                    ).astype(jnp.bfloat16)

        lp = dict(
            wt=w(keys[1], (hidden, hidden)),  bt=jnp.zeros((1, hidden), jnp.float32),
            wsc=w(keys[2], (hidden, hidden)), bsc=jnp.zeros((1, hidden), jnp.float32),
            wqkv=w(keys[3], (hidden, 3 * hidden)),
            bqkv=jnp.zeros((1, 3 * hidden), jnp.float32),
            wao=w(keys[4], (hidden, hidden)), bao=jnp.zeros((1, hidden), jnp.float32),
            ln1g=jnp.ones((1, hidden), jnp.float32),
            ln1b=jnp.zeros((1, hidden), jnp.float32),
            wi=w(keys[5], (hidden, intermediate)),
            bi=jnp.zeros((1, intermediate), jnp.float32),
            wo=w(keys[6], (intermediate, hidden)),
            bo=jnp.zeros((1, hidden), jnp.float32),
            ln2g=jnp.ones((1, hidden), jnp.float32),
            ln2b=jnp.zeros((1, hidden), jnp.float32),
        )
        params.append(lp)
    return params


# ----------------------------- main -------------------------------------------

if __name__ == "__main__":
    # small "config"
    B, S, H = 2, 8, 32
    NUM_HEADS = 4
    INTERMEDIATE = 64
    NUM_HIDDEN_LAYERS = 4      # -> 2 input blocks + 2 output blocks
    USE_SELF_COND = True

    key = jax.random.PRNGKey(0)
    k_x, k_t, k_sc, k_p = jax.random.split(key, 4)

    x = jax.random.normal(k_x, (B, S, H), dtype=jnp.float32)
    emb_t = jax.random.normal(k_t, (B, 1, H), dtype=jnp.float32)
    x_0_self_cond = jax.random.normal(k_sc, (B, S, H), dtype=jnp.float32)

    # binary padding mask -> additive attention mask (B, 1, S): 0 keep, -1e4 pad
    pad_mask = jnp.ones((B, S), dtype=jnp.float32).at[1, S - 2:].set(0.0)
    attn_mask_add = ((1.0 - pad_mask) * -10000.0)[:, None, :]

    params = init_params(k_p, NUM_HIDDEN_LAYERS, H, INTERMEDIATE)

    out = transformer_encoder_forward(
        x, emb_t, attn_mask_add, x_0_self_cond, params,
        num_hidden_layers=NUM_HIDDEN_LAYERS,
        num_heads=NUM_HEADS,
        use_self_cond=USE_SELF_COND,
    )
    out = jax.block_until_ready(out)

    assert out.shape == (B, S, H)
    assert bool(jnp.all(jnp.isfinite(out)))
    print("KERNEL_OK")
</pallas_src>

<mosaic_0001>
module attributes {stable_mosaic.version = 11 : i64} {
  func.func @bert_layer_kernel(%arg0: i32, %arg1: memref<1x8x32xf32, #tpu.memory_space<vmem>>, %arg2: memref<1x1x32xf32, #tpu.memory_space<vmem>>, %arg3: memref<1x8x32xf32, #tpu.memory_space<vmem>>, %arg4: memref<32x32xbf16, #tpu.memory_space<vmem>>, %arg5: memref<1x32xf32, #tpu.memory_space<vmem>>, %arg6: memref<1x1x8xf32, #tpu.memory_space<vmem>>, %arg7: memref<32x96xbf16, #tpu.memory_space<vmem>>, %arg8: memref<1x96xf32, #tpu.memory_space<vmem>>, %arg9: memref<32x32xbf16, #tpu.memory_space<vmem>>, %arg10: memref<1x32xf32, #tpu.memory_space<vmem>>, %arg11: memref<1x32xf32, #tpu.memory_space<vmem>>, %arg12: memref<1x32xf32, #tpu.memory_space<vmem>>, %arg13: memref<32x64xbf16, #tpu.memory_space<vmem>>, %arg14: memref<1x64xf32, #tpu.memory_space<vmem>>, %arg15: memref<64x32xbf16, #tpu.memory_space<vmem>>, %arg16: memref<1x32xf32, #tpu.memory_space<vmem>>, %arg17: memref<1x32xf32, #tpu.memory_space<vmem>>, %arg18: memref<1x32xf32, #tpu.memory_space<vmem>>, %arg19: memref<1x8x32xf32, #tpu.memory_space<vmem>>) attributes {dimension_semantics = [#tpu.dimension_semantics<parallel>], iteration_bounds = array<i64: 2>, scalar_prefetch = 0 : i64, scratch_operands = 0 : i64, tpu.core_type = #tpu.core_type<tc>, window_params = [{transform_indices = @transform_0, window_bounds = array<i64: 1, 8, 32>}, {transform_indices = @transform_1, window_bounds = array<i64: 1, 1, 32>}, {transform_indices = @transform_2, window_bounds = array<i64: 1, 8, 32>}, {pipeline_mode = #tpu.pipeline_mode<synchronous>, transform_indices = @transform_3, window_bounds = array<i64: 32, 32>}, {pipeline_mode = #tpu.pipeline_mode<synchronous>, transform_indices = @transform_4, window_bounds = array<i64: 1, 32>}, {transform_indices = @transform_5, window_bounds = array<i64: 1, 1, 8>}, {pipeline_mode = #tpu.pipeline_mode<synchronous>, transform_indices = @transform_6, window_bounds = array<i64: 32, 96>}, {pipeline_mode = #tpu.pipeline_mode<synchronous>, transform_indices = @transform_7, window_bounds = array<i64: 1, 96>}, {pipeline_mode = #tpu.pipeline_mode<synchronous>, transform_indices = @transform_8, window_bounds = array<i64: 32, 32>}, {pipeline_mode = #tpu.pipeline_mode<synchronous>, transform_indices = @transform_9, window_bounds = array<i64: 1, 32>}, {pipeline_mode = #tpu.pipeline_mode<synchronous>, transform_indices = @transform_10, window_bounds = array<i64: 1, 32>}, {pipeline_mode = #tpu.pipeline_mode<synchronous>, transform_indices = @transform_11, window_bounds = array<i64: 1, 32>}, {pipeline_mode = #tpu.pipeline_mode<synchronous>, transform_indices = @transform_12, window_bounds = array<i64: 32, 64>}, {pipeline_mode = #tpu.pipeline_mode<synchronous>, transform_indices = @transform_13, window_bounds = array<i64: 1, 64>}, {pipeline_mode = #tpu.pipeline_mode<synchronous>, transform_indices = @transform_14, window_bounds = array<i64: 64, 32>}, {pipeline_mode = #tpu.pipeline_mode<synchronous>, transform_indices = @transform_15, window_bounds = array<i64: 1, 32>}, {pipeline_mode = #tpu.pipeline_mode<synchronous>, transform_indices = @transform_16, window_bounds = array<i64: 1, 32>}, {pipeline_mode = #tpu.pipeline_mode<synchronous>, transform_indices = @transform_17, window_bounds = array<i64: 1, 32>}, {transform_indices = @transform_18, window_bounds = array<i64: 1, 8, 32>}]} {
    %c0 = arith.constant 0 : index
    %c0_0 = arith.constant 0 : index
    %c0_1 = arith.constant 0 : index
    %0 = vector.load %arg1[%c0, %c0_0, %c0_1] : memref<1x8x32xf32, #tpu.memory_space<vmem>>, vector<1x8x32xf32>
    %1 = vector.shape_cast %0 : vector<1x8x32xf32> to vector<8x32xf32>
    %c0_2 = arith.constant 0 : index
    %c0_3 = arith.constant 0 : index
    %c0_4 = arith.constant 0 : index
    %2 = vector.load %arg2[%c0_2, %c0_3, %c0_4] : memref<1x1x32xf32, #tpu.memory_space<vmem>>, vector<1x1x32xf32>
    %3 = vector.shape_cast %2 : vector<1x1x32xf32> to vector<1x32xf32>
    %4 = vector.broadcast %3 : vector<1x32xf32> to vector<8x32xf32>
    %5 = arith.addf %1, %4 : vector<8x32xf32>
    %c0_5 = arith.constant 0 : index
    %c0_6 = arith.constant 0 : index
    %c0_7 = arith.constant 0 : index
    %6 = vector.load %arg3[%c0_5, %c0_6, %c0_7] : memref<1x8x32xf32, #tpu.memory_space<vmem>>, vector<1x8x32xf32>
    %7 = vector.shape_cast %6 : vector<1x8x32xf32> to vector<8x32xf32>
    %8 = arith.truncf %7 : vector<8x32xf32> to vector<8x32xbf16>
    %c0_8 = arith.constant 0 : index
    %c0_9 = arith.constant 0 : index
    %9 = vector.load %arg4[%c0_8, %c0_9] : memref<32x32xbf16, #tpu.memory_space<vmem>>, vector<32x32xbf16>
    %cst = arith.constant dense<0.000000e+00> : vector<8x32xf32>
    %10 = tpu.matmul %8, %9, %cst {dimension_numbers = #tpu.dot_dimension_numbers<[1], [0], [0], [1], [0, 0, 1, 1], [], []>} : vector<8x32xbf16>, vector<32x32xbf16>, vector<8x32xf32> -> vector<8x32xf32>
    %c0_10 = arith.constant 0 : index
    %c0_11 = arith.constant 0 : index
    %11 = vector.load %arg5[%c0_10, %c0_11] : memref<1x32xf32, #tpu.memory_space<vmem>>, vector<1x32xf32>
    %12 = vector.broadcast %11 : vector<1x32xf32> to vector<8x32xf32>
    %13 = arith.addf %10, %12 : vector<8x32xf32>
    %14 = arith.addf %5, %13 : vector<8x32xf32>
    %15 = arith.truncf %14 : vector<8x32xf32> to vector<8x32xbf16>
    %c0_12 = arith.constant 0 : index
    %c0_13 = arith.constant 0 : index
    %16 = vector.load %arg7[%c0_12, %c0_13] : memref<32x96xbf16, #tpu.memory_space<vmem>>, vector<32x96xbf16>
    %cst_14 = arith.constant dense<0.000000e+00> : vector<8x96xf32>
    %17 = tpu.matmul %15, %16, %cst_14 {dimension_numbers = #tpu.dot_dimension_numbers<[1], [0], [0], [1], [0, 0, 1, 1], [], []>} : vector<8x32xbf16>, vector<32x96xbf16>, vector<8x96xf32> -> vector<8x96xf32>
    %c0_15 = arith.constant 0 : index
    %c0_16 = arith.constant 0 : index
    %18 = vector.load %arg8[%c0_15, %c0_16] : memref<1x96xf32, #tpu.memory_space<vmem>>, vector<1x96xf32>
    %19 = vector.broadcast %18 : vector<1x96xf32> to vector<8x96xf32>
    %20 = arith.addf %17, %19 : vector<8x96xf32>
    %21 = vector.extract_strided_slice %20 {offsets = [0, 0], sizes = [8, 32], strides = [1, 1]} : vector<8x96xf32> to vector<8x32xf32>
    %cst_17 = arith.constant 0.353553385 : f32
    %22 = vector.broadcast %cst_17 : f32 to vector<8x32xf32>
    %23 = arith.mulf %21, %22 : vector<8x32xf32>
    %24 = arith.truncf %23 : vector<8x32xf32> to vector<8x32xbf16>
    %25 = vector.extract_strided_slice %20 {offsets = [0, 32], sizes = [8, 32], strides = [1, 1]} : vector<8x96xf32> to vector<8x32xf32>
    %26 = arith.truncf %25 : vector<8x32xf32> to vector<8x32xbf16>
    %27 = vector.extract_strided_slice %20 {offsets = [0, 64], sizes = [8, 32], strides = [1, 1]} : vector<8x96xf32> to vector<8x32xf32>
    %28 = arith.truncf %27 : vector<8x32xf32> to vector<8x32xbf16>
    %c0_18 = arith.constant 0 : index
    %c0_19 = arith.constant 0 : index
    %c0_20 = arith.constant 0 : index
    %29 = vector.load %arg6[%c0_18, %c0_19, %c0_20] : memref<1x1x8xf32, #tpu.memory_space<vmem>>, vector<1x1x8xf32>
    %30 = vector.shape_cast %29 : vector<1x1x8xf32> to vector<1x8xf32>
    %cst_21 = arith.constant 0.000000e+00 : f32
    %31 = vector.broadcast %cst_21 : f32 to vector<8x32xf32>
    %32 = vector.extract_strided_slice %24 {offsets = [0, 0], sizes = [8, 8], strides = [1, 1]} : vector<8x32xbf16> to vector<8x8xbf16>
    %33 = vector.extract_strided_slice %26 {offsets = [0, 0], sizes = [8, 8], strides = [1, 1]} : vector<8x32xbf16> to vector<8x8xbf16>
    %34 = vector.extract_strided_slice %28 {offsets = [0, 0], sizes = [8, 8], strides = [1, 1]} : vector<8x32xbf16> to vector<8x8xbf16>
    %cst_22 = arith.constant dense<0.000000e+00> : vector<8x8xf32>
    %35 = tpu.matmul %32, %33, %cst_22 {dimension_numbers = #tpu.dot_dimension_numbers<[1], [1], [0], [0], [0, 0, 1, 0], [], []>} : vector<8x8xbf16>, vector<8x8xbf16>, vector<8x8xf32> -> vector<8x8xf32>
    %36 = vector.broadcast %30 : vector<1x8xf32> to vector<8x8xf32>
    %37 = arith.addf %35, %36 : vector<8x8xf32>
    %cst_23 = arith.constant dense<0xFF800000> : vector<8xf32>
    %38 = vector.multi_reduction <maximumf>, %37, %cst_23 [1] : vector<8x8xf32> to vector<8xf32>
    %39 = vector.shape_cast %38 : vector<8xf32> to vector<8x1xf32>
    %40 = vector.broadcast %39 : vector<8x1xf32> to vector<8x8xf32>
    %41 = arith.subf %37, %40 : vector<8x8xf32>
    %42 = math.exp %41 : vector<8x8xf32>
    %cst_24 = arith.constant dense<0.000000e+00> : vector<8xf32>
    %43 = vector.multi_reduction <add>, %42, %cst_24 [1] : vector<8x8xf32> to vector<8xf32>
    %44 = vector.shape_cast %43 : vector<8xf32> to vector<8x1xf32>
    %45 = tpu.reciprocal %44 {approx = true} : vector<8x1xf32> -> vector<8x1xf32>
    %46 = vector.broadcast %45 : vector<8x1xf32> to vector<8x8xf32>
    %47 = arith.mulf %42, %46 : vector<8x8xf32>
    %48 = arith.truncf %47 : vector<8x8xf32> to vector<8x8xbf16>
    %cst_25 = arith.constant dense<0.000000e+00> : vector<8x8xf32>
    %49 = tpu.matmul %48, %34, %cst_25 {dimension_numbers = #tpu.dot_dimension_numbers<[1], [0], [0], [1], [0, 0, 1, 1], [], []>} : vector<8x8xbf16>, vector<8x8xbf16>, vector<8x8xf32> -> vector<8x8xf32>
    %50 = arith.truncf %49 : vector<8x8xf32> to vector<8x8xbf16>
    %c0_26 = arith.constant 0 : index
    %c0_27 = arith.constant 0 : index
    %51 = vector.load %arg9[%c0_26, %c0_27] : memref<32x32xbf16, #tpu.memory_space<vmem>>, vector<8x32xbf16>
    %cst_28 = arith.constant dense<0.000000e+00> : vector<8x32xf32>
    %52 = tpu.matmul %50, %51, %cst_28 {dimension_numbers = #tpu.dot_dimension_numbers<[1], [0], [0], [1], [0, 0, 1, 1], [], []>} : vector<8x8xbf16>, vector<8x32xbf16>, vector<8x32xf32> -> vector<8x32xf32>
    %53 = arith.addf %31, %52 : vector<8x32xf32>
    %54 = vector.extract_strided_slice %24 {offsets = [0, 8], sizes = [8, 8], strides = [1, 1]} : vector<8x32xbf16> to vector<8x8xbf16>
    %55 = vector.extract_strided_slice %26 {offsets = [0, 8], sizes = [8, 8], strides = [1, 1]} : vector<8x32xbf16> to vector<8x8xbf16>
    %56 = vector.extract_strided_slice %28 {offsets = [0, 8], sizes = [8, 8], strides = [1, 1]} : vector<8x32xbf16> to vector<8x8xbf16>
    %cst_29 = arith.constant dense<0.000000e+00> : vector<8x8xf32>
    %57 = tpu.matmul %54, %55, %cst_29 {dimension_numbers = #tpu.dot_dimension_numbers<[1], [1], [0], [0], [0, 0, 1, 0], [], []>} : vector<8x8xbf16>, vector<8x8xbf16>, vector<8x8xf32> -> vector<8x8xf32>
    %58 = vector.broadcast %30 : vector<1x8xf32> to vector<8x8xf32>
    %59 = arith.addf %57, %58 : vector<8x8xf32>
    %cst_30 = arith.constant dense<0xFF800000> : vector<8xf32>
    %60 = vector.multi_reduction <maximumf>, %59, %cst_30 [1] : vector<8x8xf32> to vector<8xf32>
    %61 = vector.shape_cast %60 : vector<8xf32> to vector<8x1xf32>
    %62 = vector.broadcast %61 : vector<8x1xf32> to vector<8x8xf32>
    %63 = arith.subf %59, %62 : vector<8x8xf32>
    %64 = math.exp %63 : vector<8x8xf32>
    %cst_31 = arith.constant dense<0.000000e+00> : vector<8xf32>
    %65 = vector.multi_reduction <add>, %64, %cst_31 [1] : vector<8x8xf32> to vector<8xf32>
    %66 = vector.shape_cast %65 : vector<8xf32> to vector<8x1xf32>
    %67 = tpu.reciprocal %66 {approx = true} : vector<8x1xf32> -> vector<8x1xf32>
    %68 = vector.broadcast %67 : vector<8x1xf32> to vector<8x8xf32>
    %69 = arith.mulf %64, %68 : vector<8x8xf32>
    %70 = arith.truncf %69 : vector<8x8xf32> to vector<8x8xbf16>
    %cst_32 = arith.constant dense<0.000000e+00> : vector<8x8xf32>
    %71 = tpu.matmul %70, %56, %cst_32 {dimension_numbers = #tpu.dot_dimension_numbers<[1], [0], [0], [1], [0, 0, 1, 1], [], []>} : vector<8x8xbf16>, vector<8x8xbf16>, vector<8x8xf32> -> vector<8x8xf32>
    %72 = arith.truncf %71 : vector<8x8xf32> to vector<8x8xbf16>
    %c8 = arith.constant 8 : index
    %c0_33 = arith.constant 0 : index
    %73 = vector.load %arg9[%c8, %c0_33] : memref<32x32xbf16, #tpu.memory_space<vmem>>, vector<8x32xbf16>
    %cst_34 = arith.constant dense<0.000000e+00> : vector<8x32xf32>
    %74 = tpu.matmul %72, %73, %cst_34 {dimension_numbers = #tpu.dot_dimension_numbers<[1], [0], [0], [1], [0, 0, 1, 1], [], []>} : vector<8x8xbf16>, vector<8x32xbf16>, vector<8x32xf32> -> vector<8x32xf32>
    %75 = arith.addf %53, %74 : vector<8x32xf32>
    %76 = vector.extract_strided_slice %24 {offsets = [0, 16], sizes = [8, 8], strides = [1, 1]} : vector<8x32xbf16> to vector<8x8xbf16>
    %77 = vector.extract_strided_slice %26 {offsets = [0, 16], sizes = [8, 8], strides = [1, 1]} : vector<8x32xbf16> to vector<8x8xbf16>
    %78 = vector.extract_strided_slice %28 {offsets = [0, 16], sizes = [8, 8], strides = [1, 1]} : vector<8x32xbf16> to vector<8x8xbf16>
    %cst_35 = arith.constant dense<0.000000e+00> : vector<8x8xf32>
    %79 = tpu.matmul %76, %77, %cst_35 {dimension_numbers = #tpu.dot_dimension_numbers<[1], [1], [0], [0], [0, 0, 1, 0], [], []>} : vector<8x8xbf16>, vector<8x8xbf16>, vector<8x8xf32> -> vector<8x8xf32>
    %80 = vector.broadcast %30 : vector<1x8xf32> to vector<8x8xf32>
    %81 = arith.addf %79, %80 : vector<8x8xf32>
    %cst_36 = arith.constant dense<0xFF800000> : vector<8xf32>
    %82 = vector.multi_reduction <maximumf>, %81, %cst_36 [1] : vector<8x8xf32> to vector<8xf32>
    %83 = vector.shape_cast %82 : vector<8xf32> to vector<8x1xf32>
    %84 = vector.broadcast %83 : vector<8x1xf32> to vector<8x8xf32>
    %85 = arith.subf %81, %84 : vector<8x8xf32>
    %86 = math.exp %85 : vector<8x8xf32>
    %cst_37 = arith.constant dense<0.000000e+00> : vector<8xf32>
    %87 = vector.multi_reduction <add>, %86, %cst_37 [1] : vector<8x8xf32> to vector<8xf32>
    %88 = vector.shape_cast %87 : vector<8xf32> to vector<8x1xf32>
    %89 = tpu.reciprocal %88 {approx = true} : vector<8x1xf32> -> vector<8x1xf32>
    %90 = vector.broadcast %89 : vector<8x1xf32> to vector<8x8xf32>
    %91 = arith.mulf %86, %90 : vector<8x8xf32>
    %92 = arith.truncf %91 : vector<8x8xf32> to vector<8x8xbf16>
    %cst_38 = arith.constant dense<0.000000e+00> : vector<8x8xf32>
    %93 = tpu.matmul %92, %78, %cst_38 {dimension_numbers = #tpu.dot_dimension_numbers<[1], [0], [0], [1], [0, 0, 1, 1], [], []>} : vector<8x8xbf16>, vector<8x8xbf16>, vector<8x8xf32> -> vector<8x8xf32>
    %94 = arith.truncf %93 : vector<8x8xf32> to vector<8x8xbf16>
    %c16 = arith.constant 16 : index
    %c0_39 = arith.constant 0 : index
    %95 = vector.load %arg9[%c16, %c0_39] : memref<32x32xbf16, #tpu.memory_space<vmem>>, vector<8x32xbf16>
    %cst_40 = arith.constant dense<0.000000e+00> : vector<8x32xf32>
    %96 = tpu.matmul %94, %95, %cst_40 {dimension_numbers = #tpu.dot_dimension_numbers<[1], [0], [0], [1], [0, 0, 1, 1], [], []>} : vector<8x8xbf16>, vector<8x32xbf16>, vector<8x32xf32> -> vector<8x32xf32>
    %97 = arith.addf %75, %96 : vector<8x32xf32>
    %98 = vector.extract_strided_slice %24 {offsets = [0, 24], sizes = [8, 8], strides = [1, 1]} : vector<8x32xbf16> to vector<8x8xbf16>
    %99 = vector.extract_strided_slice %26 {offsets = [0, 24], sizes = [8, 8], strides = [1, 1]} : vector<8x32xbf16> to vector<8x8xbf16>
    %100 = vector.extract_strided_slice %28 {offsets = [0, 24], sizes = [8, 8], strides = [1, 1]} : vector<8x32xbf16> to vector<8x8xbf16>
    %cst_41 = arith.constant dense<0.000000e+00> : vector<8x8xf32>
    %101 = tpu.matmul %98, %99, %cst_41 {dimension_numbers = #tpu.dot_dimension_numbers<[1], [1], [0], [0], [0, 0, 1, 0], [], []>} : vector<8x8xbf16>, vector<8x8xbf16>, vector<8x8xf32> -> vector<8x8xf32>
    %102 = vector.broadcast %30 : vector<1x8xf32> to vector<8x8xf32>
    %103 = arith.addf %101, %102 : vector<8x8xf32>
    %cst_42 = arith.constant dense<0xFF800000> : vector<8xf32>
    %104 = vector.multi_reduction <maximumf>, %103, %cst_42 [1] : vector<8x8xf32> to vector<8xf32>
    %105 = vector.shape_cast %104 : vector<8xf32> to vector<8x1xf32>
    %106 = vector.broadcast %105 : vector<8x1xf32> to vector<8x8xf32>
    %107 = arith.subf %103, %106 : vector<8x8xf32>
    %108 = math.exp %107 : vector<8x8xf32>
    %cst_43 = arith.constant dense<0.000000e+00> : vector<8xf32>
    %109 = vector.multi_reduction <add>, %108, %cst_43 [1] : vector<8x8xf32> to vector<8xf32>
    %110 = vector.shape_cast %109 : vector<8xf32> to vector<8x1xf32>
    %111 = tpu.reciprocal %110 {approx = true} : vector<8x1xf32> -> vector<8x1xf32>
    %112 = vector.broadcast %111 : vector<8x1xf32> to vector<8x8xf32>
    %113 = arith.mulf %108, %112 : vector<8x8xf32>
    %114 = arith.truncf %113 : vector<8x8xf32> to vector<8x8xbf16>
    %cst_44 = arith.constant dense<0.000000e+00> : vector<8x8xf32>
    %115 = tpu.matmul %114, %100, %cst_44 {dimension_numbers = #tpu.dot_dimension_numbers<[1], [0], [0], [1], [0, 0, 1, 1], [], []>} : vector<8x8xbf16>, vector<8x8xbf16>, vector<8x8xf32> -> vector<8x8xf32>
    %116 = arith.truncf %115 : vector<8x8xf32> to vector<8x8xbf16>
    %c24 = arith.constant 24 : index
    %c0_45 = arith.constant 0 : index
    %117 = vector.load %arg9[%c24, %c0_45] : memref<32x32xbf16, #tpu.memory_space<vmem>>, vector<8x32xbf16>
    %cst_46 = arith.constant dense<0.000000e+00> : vector<8x32xf32>
    %118 = tpu.matmul %116, %117, %cst_46 {dimension_numbers = #tpu.dot_dimension_numbers<[1], [0], [0], [1], [0, 0, 1, 1], [], []>} : vector<8x8xbf16>, vector<8x32xbf16>, vector<8x32xf32> -> vector<8x32xf32>
    %119 = arith.addf %97, %118 : vector<8x32xf32>
    %c0_47 = arith.constant 0 : index
    %c0_48 = arith.constant 0 : index
    %120 = vector.load %arg10[%c0_47, %c0_48] : memref<1x32xf32, #tpu.memory_space<vmem>>, vector<1x32xf32>
    %121 = vector.broadcast %120 : vector<1x32xf32> to vector<8x32xf32>
    %122 = arith.addf %119, %121 : vector<8x32xf32>
    %123 = arith.addf %122, %14 : vector<8x32xf32>
    %cst_49 = arith.constant dense<0.000000e+00> : vector<8xf32>
    %124 = vector.multi_reduction <add>, %123, %cst_49 [1] : vector<8x32xf32> to vector<8xf32>
    %125 = vector.shape_cast %124 : vector<8xf32> to vector<8x1xf32>
    %cst_50 = arith.constant 3.200000e+01 : f32
    %126 = vector.broadcast %cst_50 : f32 to vector<8x1xf32>
    %127 = arith.divf %125, %126 : vector<8x1xf32>
    %128 = vector.broadcast %127 : vector<8x1xf32> to vector<8x32xf32>
    %129 = arith.subf %123, %128 : vector<8x32xf32>
    %130 = arith.mulf %129, %129 : vector<8x32xf32>
    %cst_51 = arith.constant dense<0.000000e+00> : vector<8xf32>
    %131 = vector.multi_reduction <add>, %130, %cst_51 [1] : vector<8x32xf32> to vector<8xf32>
    %132 = vector.shape_cast %131 : vector<8xf32> to vector<8x1xf32>
    %cst_52 = arith.constant 3.200000e+01 : f32
    %133 = vector.broadcast %cst_52 : f32 to vector<8x1xf32>
    %134 = arith.divf %132, %133 : vector<8x1xf32>
    %135 = vector.broadcast %127 : vector<8x1xf32> to vector<8x32xf32>
    %136 = arith.subf %123, %135 : vector<8x32xf32>
    %cst_53 = arith.constant 9.99999996E-13 : f32
    %137 = vector.broadcast %cst_53 : f32 to vector<8x1xf32>
    %138 = arith.addf %134, %137 : vector<8x1xf32>
    %139 = math.rsqrt %138 : vector<8x1xf32>
    %140 = vector.broadcast %139 : vector<8x1xf32> to vector<8x32xf32>
    %141 = arith.mulf %136, %140 : vector<8x32xf32>
    %c0_54 = arith.constant 0 : index
    %c0_55 = arith.constant 0 : index
    %142 = vector.load %arg11[%c0_54, %c0_55] : memref<1x32xf32, #tpu.memory_space<vmem>>, vector<1x32xf32>
    %143 = vector.broadcast %142 : vector<1x32xf32> to vector<8x32xf32>
    %144 = arith.mulf %141, %143 : vector<8x32xf32>
    %c0_56 = arith.constant 0 : index
    %c0_57 = arith.constant 0 : index
    %145 = vector.load %arg12[%c0_56, %c0_57] : memref<1x32xf32, #tpu.memory_space<vmem>>, vector<1x32xf32>
    %146 = vector.broadcast %145 : vector<1x32xf32> to vector<8x32xf32>
    %147 = arith.addf %144, %146 : vector<8x32xf32>
    %148 = arith.truncf %147 : vector<8x32xf32> to vector<8x32xbf16>
    %c0_58 = arith.constant 0 : index
    %c0_59 = arith.constant 0 : index
    %149 = vector.load %arg13[%c0_58, %c0_59] : memref<32x64xbf16, #tpu.memory_space<vmem>>, vector<32x64xbf16>
    %cst_60 = arith.constant dense<0.000000e+00> : vector<8x64xf32>
    %150 = tpu.matmul %148, %149, %cst_60 {dimension_numbers = #tpu.dot_dimension_numbers<[1], [0], [0], [1], [0, 0, 1, 1], [], []>} : vector<8x32xbf16>, vector<32x64xbf16>, vector<8x64xf32> -> vector<8x64xf32>
    %c0_61 = arith.constant 0 : index
    %c0_62 = arith.constant 0 : index
    %151 = vector.load %arg14[%c0_61, %c0_62] : memref<1x64xf32, #tpu.memory_space<vmem>>, vector<1x64xf32>
    %152 = vector.broadcast %151 : vector<1x64xf32> to vector<8x64xf32>
    %153 = arith.addf %150, %152 : vector<8x64xf32>
    %cst_63 = arith.constant 5.000000e-01 : f32
    %154 = vector.broadcast %cst_63 : f32 to vector<8x64xf32>
    %155 = arith.mulf %154, %153 : vector<8x64xf32>
    %cst_64 = arith.constant 0.707106769 : f32
    %156 = vector.broadcast %cst_64 : f32 to vector<8x64xf32>
    %157 = arith.mulf %153, %156 : vector<8x64xf32>
    %158 = math.erf %157 : vector<8x64xf32>
    %cst_65 = arith.constant 1.000000e+00 : f32
    %159 = vector.broadcast %cst_65 : f32 to vector<8x64xf32>
    %160 = arith.addf %159, %158 : vector<8x64xf32>
    %161 = arith.mulf %155, %160 : vector<8x64xf32>
    %162 = arith.truncf %161 : vector<8x64xf32> to vector<8x64xbf16>
    %c0_66 = arith.constant 0 : index
    %c0_67 = arith.constant 0 : index
    %163 = vector.load %arg15[%c0_66, %c0_67] : memref<64x32xbf16, #tpu.memory_space<vmem>>, vector<64x32xbf16>
    %cst_68 = arith.constant dense<0.000000e+00> : vector<8x32xf32>
    %164 = tpu.matmul %162, %163, %cst_68 {dimension_numbers = #tpu.dot_dimension_numbers<[1], [0], [0], [1], [0, 0, 1, 1], [], []>} : vector<8x64xbf16>, vector<64x32xbf16>, vector<8x32xf32> -> vector<8x32xf32>
    %c0_69 = arith.constant 0 : index
    %c0_70 = arith.constant 0 : index
    %165 = vector.load %arg16[%c0_69, %c0_70] : memref<1x32xf32, #tpu.memory_space<vmem>>, vector<1x32xf32>
    %166 = vector.broadcast %165 : vector<1x32xf32> to vector<8x32xf32>
    %167 = arith.addf %164, %166 : vector<8x32xf32>
    %168 = arith.addf %167, %147 : vector<8x32xf32>
    %cst_71 = arith.constant dense<0.000000e+00> : vector<8xf32>
    %169 = vector.multi_reduction <add>, %168, %cst_71 [1] : vector<8x32xf32> to vector<8xf32>
    %170 = vector.shape_cast %169 : vector<8xf32> to vector<8x1xf32>
    %cst_72 = arith.constant 3.200000e+01 : f32
    %171 = vector.broadcast %cst_72 : f32 to vector<8x1xf32>
    %172 = arith.divf %170, %171 : vector<8x1xf32>
    %173 = vector.broadcast %172 : vector<8x1xf32> to vector<8x32xf32>
    %174 = arith.subf %168, %173 : vector<8x32xf32>
    %175 = arith.mulf %174, %174 : vector<8x32xf32>
    %cst_73 = arith.constant dense<0.000000e+00> : vector<8xf32>
    %176 = vector.multi_reduction <add>, %175, %cst_73 [1] : vector<8x32xf32> to vector<8xf32>
    %177 = vector.shape_cast %176 : vector<8xf32> to vector<8x1xf32>
    %cst_74 = arith.constant 3.200000e+01 : f32
    %178 = vector.broadcast %cst_74 : f32 to vector<8x1xf32>
    %179 = arith.divf %177, %178 : vector<8x1xf32>
    %180 = vector.broadcast %172 : vector<8x1xf32> to vector<8x32xf32>
    %181 = arith.subf %168, %180 : vector<8x32xf32>
    %cst_75 = arith.constant 9.99999996E-13 : f32
    %182 = vector.broadcast %cst_75 : f32 to vector<8x1xf32>
    %183 = arith.addf %179, %182 : vector<8x1xf32>
    %184 = math.rsqrt %183 : vector<8x1xf32>
    %185 = vector.broadcast %184 : vector<8x1xf32> to vector<8x32xf32>
    %186 = arith.mulf %181, %185 : vector<8x32xf32>
    %c0_76 = arith.constant 0 : index
    %c0_77 = arith.constant 0 : index
    %187 = vector.load %arg17[%c0_76, %c0_77] : memref<1x32xf32, #tpu.memory_space<vmem>>, vector<1x32xf32>
    %188 = vector.broadcast %187 : vector<1x32xf32> to vector<8x32xf32>
    %189 = arith.mulf %186, %188 : vector<8x32xf32>
    %c0_78 = arith.constant 0 : index
    %c0_79 = arith.constant 0 : index
    %190 = vector.load %arg18[%c0_78, %c0_79] : memref<1x32xf32, #tpu.memory_space<vmem>>, vector<1x32xf32>
    %191 = vector.broadcast %190 : vector<1x32xf32> to vector<8x32xf32>
    %192 = arith.addf %189, %191 : vector<8x32xf32>
    %c0_80 = arith.constant 0 : index
    %c0_81 = arith.constant 0 : index
    %c0_82 = arith.constant 0 : index
    %193 = vector.load %arg19[%c0_80, %c0_81, %c0_82] : memref<1x8x32xf32, #tpu.memory_space<vmem>>, vector<1x8x32xf32>
    %194 = vector.shape_cast %193 : vector<1x8x32xf32> to vector<8x32xf32>
    %195 = vector.shape_cast %192 : vector<8x32xf32> to vector<1x8x32xf32>
    tpu.vector_store %arg19[%c0_80, %c0_81, %c0_82], %195 {strides = array<i32>} : memref<1x8x32xf32, #tpu.memory_space<vmem>>, vector<1x8x32xf32>,
    return
  }
  func.func @transform_0(%arg0: i32) -> (i32, i32, i32) {
    %c0_i32 = arith.constant 0 : i32
    %c0_i32_0 = arith.constant 0 : i32
    %c0_i32_1 = arith.constant 0 : i32
    return %arg0, %c0_i32, %c0_i32_0 : i32, i32, i32
  }
  func.func @transform_1(%arg0: i32) -> (i32, i32, i32) {
    %c0_i32 = arith.constant 0 : i32
    %c0_i32_0 = arith.constant 0 : i32
    %c0_i32_1 = arith.constant 0 : i32
    return %arg0, %c0_i32, %c0_i32_0 : i32, i32, i32
  }
  func.func @transform_2(%arg0: i32) -> (i32, i32, i32) {
    %c0_i32 = arith.constant 0 : i32
    %c0_i32_0 = arith.constant 0 : i32
    %c0_i32_1 = arith.constant 0 : i32
    return %arg0, %c0_i32, %c0_i32_0 : i32, i32, i32
  }
  func.func @transform_3(%arg0: i32) -> (i32, i32) {
    %c0_i32 = arith.constant 0 : i32
    %c0_i32_0 = arith.constant 0 : i32
    %c0_i32_1 = arith.constant 0 : i32
    return %c0_i32, %c0_i32_0 : i32, i32
  }
  func.func @transform_4(%arg0: i32) -> (i32, i32) {
    %c0_i32 = arith.constant 0 : i32
    %c0_i32_0 = arith.constant 0 : i32
    %c0_i32_1 = arith.constant 0 : i32
    return %c0_i32, %c0_i32_0 : i32, i32
  }
  func.func @transform_5(%arg0: i32) -> (i32, i32, i32) {
    %c0_i32 = arith.constant 0 : i32
    %c0_i32_0 = arith.constant 0 : i32
    %c0_i32_1 = arith.constant 0 : i32
    return %arg0, %c0_i32, %c0_i32_0 : i32, i32, i32
  }
  func.func @transform_6(%arg0: i32) -> (i32, i32) {
    %c0_i32 = arith.constant 0 : i32
    %c0_i32_0 = arith.constant 0 : i32
    %c0_i32_1 = arith.constant 0 : i32
    return %c0_i32, %c0_i32_0 : i32, i32
  }
  func.func @transform_7(%arg0: i32) -> (i32, i32) {
    %c0_i32 = arith.constant 0 : i32
    %c0_i32_0 = arith.constant 0 : i32
    %c0_i32_1 = arith.constant 0 : i32
    return %c0_i32, %c0_i32_0 : i32, i32
  }
  func.func @transform_8(%arg0: i32) -> (i32, i32) {
    %c0_i32 = arith.constant 0 : i32
    %c0_i32_0 = arith.constant 0 : i32
    %c0_i32_1 = arith.constant 0 : i32
    return %c0_i32, %c0_i32_0 : i32, i32
  }
  func.func @transform_9(%arg0: i32) -> (i32, i32) {
    %c0_i32 = arith.constant 0 : i32
    %c0_i32_0 = arith.constant 0 : i32
    %c0_i32_1 = arith.constant 0 : i32
    return %c0_i32, %c0_i32_0 : i32, i32
  }
  func.func @transform_10(%arg0: i32) -> (i32, i32) {
    %c0_i32 = arith.constant 0 : i32
    %c0_i32_0 = arith.constant 0 : i32
    %c0_i32_1 = arith.constant 0 : i32
    return %c0_i32, %c0_i32_0 : i32, i32
  }
  func.func @transform_11(%arg0: i32) -> (i32, i32) {
    %c0_i32 = arith.constant 0 : i32
    %c0_i32_0 = arith.constant 0 : i32
    %c0_i32_1 = arith.constant 0 : i32
    return %c0_i32, %c0_i32_0 : i32, i32
  }
  func.func @transform_12(%arg0: i32) -> (i32, i32) {
    %c0_i32 = arith.constant 0 : i32
    %c0_i32_0 = arith.constant 0 : i32
    %c0_i32_1 = arith.constant 0 : i32
    return %c0_i32, %c0_i32_0 : i32, i32
  }
  func.func @transform_13(%arg0: i32) -> (i32, i32) {
    %c0_i32 = arith.constant 0 : i32
    %c0_i32_0 = arith.constant 0 : i32
    %c0_i32_1 = arith.constant 0 : i32
    return %c0_i32, %c0_i32_0 : i32, i32
  }
  func.func @transform_14(%arg0: i32) -> (i32, i32) {
    %c0_i32 = arith.constant 0 : i32
    %c0_i32_0 = arith.constant 0 : i32
    %c0_i32_1 = arith.constant 0 : i32
    return %c0_i32, %c0_i32_0 : i32, i32
  }
  func.func @transform_15(%arg0: i32) -> (i32, i32) {
    %c0_i32 = arith.constant 0 : i32
    %c0_i32_0 = arith.constant 0 : i32
    %c0_i32_1 = arith.constant 0 : i32
    return %c0_i32, %c0_i32_0 : i32, i32
  }
  func.func @transform_16(%arg0: i32) -> (i32, i32) {
    %c0_i32 = arith.constant 0 : i32
    %c0_i32_0 = arith.constant 0 : i32
    %c0_i32_1 = arith.constant 0 : i32
    return %c0_i32, %c0_i32_0 : i32, i32
  }
  func.func @transform_17(%arg0: i32) -> (i32, i32) {
    %c0_i32 = arith.constant 0 : i32
    %c0_i32_0 = arith.constant 0 : i32
    %c0_i32_1 = arith.constant 0 : i32
    return %c0_i32, %c0_i32_0 : i32, i32
  }
  func.func @transform_18(%arg0: i32) -> (i32, i32, i32) {
    %c0_i32 = arith.constant 0 : i32
    %c0_i32_0 = arith.constant 0 : i32
    %c0_i32_1 = arith.constant 0 : i32
    return %arg0, %c0_i32, %c0_i32_0 : i32, i32, i32
  }
}

</mosaic_0001>

<bundles_post_ra>
// kernel: tpu_custom_call.1
= control target key start
LH: loop header
LB: loop body
LE: loop exit
PB: predicated region body
PF: predicated region fallthrough
CT: control target
= control target key end

     0   :  { %s2826_s0 = inlined_call_operand.vmem [shape: f32[2,8,32], index: 0, kind: input, shape index: {}]   ;;  %s2827_s1 = inlined_call_operand.hbm [shape: f32[2,1,32], index: 1, kind: input, shape index: {}]   ;;  %s2828_s2 = inlined_call_operand.vmem [shape: f32[2,8,32], index: 2, kind: input, shape index: {}]   ;;  %s2829_s3 = inlined_call_operand.vmem [shape: bf16[32,32], index: 3, kind: input, shape index: {}]   ;;  %s2830_s4 = inlined_call_operand.vmem [shape: f32[1,32], index: 4, kind: input, shape index: {}]   ;;  %s2831_s5 = inlined_call_operand.vmem [shape: f32[2,1,8], index: 5, kind: input, shape index: {}]   ;;  %s2832_s6 = inlined_call_operand.hbm [shape: bf16[32,96], index: 6, kind: input, shape index: {}]   ;;  %s2833_s7 = inlined_call_operand.vmem [shape: f32[1,96], index: 7, kind: input, shape index: {}]   ;;  %s2834_s8 = inlined_call_operand.hbm [shape: bf16[32,32], index: 8, kind: input, shape index: {}]   ;;  %s2835_s9 = inlined_call_operand.vmem [shape: f32[1,32], index: 9, kind: input, shape index: {}]   ;;  %s2836_s10 = inlined_call_operand.vmem [shape: f32[1,32], index: 10, kind: input, shape index: {}]   ;;  %s2837_s11 = inlined_call_operand.vmem [shape: f32[1,32], index: 11, kind: input, shape index: {}]   ;;  %s2838_s12 = inlined_call_operand.hbm [shape: bf16[32,64], index: 12, kind: input, shape index: {}]   ;;  %s2839_s13 = inlined_call_operand.vmem [shape: f32[1,64], index: 13, kind: input, shape index: {}]   ;;  %s2840_s14 = inlined_call_operand.vmem [shape: bf16[64,32], index: 14, kind: input, shape index: {}]   ;;  %s2841_s15 = inlined_call_operand.vmem [shape: f32[1,32], index: 15, kind: input, shape index: {}]   ;;  %s2842_s16 = inlined_call_operand.vmem [shape: f32[1,32], index: 16, kind: input, shape index: {}]   ;;  %s2843_s17 = inlined_call_operand.vmem [shape: f32[1,32], index: 17, kind: input, shape index: {}]   ;;  %s2844_s18 = inlined_call_operand.hbm [shape: f32[2,8,32], index: 18, kind: output, shape index: {}]  }
   0x1   :  { %2857 = sst [smem:[#allocation21_spill]] %s2826_s0 }
   0x2   :  { %2858 = sst [smem:[#allocation22_spill]] %s2827_s1 }
   0x3   :  { %2859 = sst [smem:[#allocation23_spill]] %s2828_s2 }
   0x4   :  { %2860 = sst [smem:[#allocation24_spill]] %s2832_s6 }
   0x5   :  { %2861 = sst [smem:[#allocation25_spill]] %s2834_s8 }
   0x6   :  { %2862 = sst [smem:[#allocation26_spill]] %s2838_s12 }
   0x7   :  { %2863 = sst [smem:[#allocation27_spill]] %s2843_s17 }
   0x8   :  { %2864 = sst [smem:[#allocation28_spill]] %s2844_s18 }
   0x9   :  { %23 = vsyncpa [#allocation3], 0 }
   0xa   :  { %25 = vsyncpa [#allocation3 + $0x1], 0 }
   0xb   :  { %26 = vsyncpa [#allocation6], 0 }
   0xc   :  { %27 = vsyncpa [#allocation9], 0 }
   0xd   :  { %28 = vsyncpa [#allocation4], 0 }
   0xe   :  { %30 = vsyncpa [#allocation4 + $0x1], 0  ;;  %s2462_s27 = smov 0   ;;  %s2464_s28 = smov 0  }
   0xf   :  { %s2466_s29 = smov 0   ;;  %s2468_s30 = smov 0  }
  0x10 LB: > { %2865 = sst [smem:[#allocation15_spill]] %s2333_s27  ;;  %s2483_s0 = sadd.s32 4294967295, %s2345_s30   ;;  %s2345_s30 = sphi %s2468_s30, %s2898_s30   ;;  %s2341_s29 = sphi %s2466_s29, %s2900_s29   ;;  %s2337_s28 = sphi %s2464_s28, %s2902_s28   ;;  %s2333_s27 = sphi %s2462_s27, %s2901_s27  }
  0x11   : > { %2866 = sst [smem:[#allocation16_spill]] %s2341_s29  ;;  %s1842_s19 = sadd.s32 4294967294, %s2345_s30  }
  0x12   : > { %2867 = sst [smem:[#allocation17_spill]] %s2345_s30  ;;  %p82_p0 = scmp.ne.s32.totalorder %s2337_s28, %s2333_s27 }
  0x13   : > { %p2849_p1 = scmp.eq.s32.totalorder %s2483_s0, 0  ;;  %p458_p3 = scmp.eq.s32.totalorder %s1842_s19, 1 }
  0x14   : > { %p1843_p5 = scmp.ge.s32.totalorder %s2345_s30, 1  ;;  %p465_p7 = scmp.lt.s32.totalorder %s2345_s30, 3 }
  0x15   : > { %p2492_p4 = por %p2849_p1, %p82_p0  ;;  %p2497_p6 = por %p458_p3, %p82_p0 }
  0x16   : > { %p2502_p8 = pnand %p1843_p5, %p465_p7  ;;  %s2347_s22 = smov [#allocation5]  }
  0x17   : > { %s2868_s1 = scalar_select %p2492_p4, 1, 0 }
  0x18   : > { %s2869_s20 = scalar_select %p2497_p6, 1, 0 }
  0x19   : > { %s2871_s21 = scalar_select %p2502_p8, 1, 0 }
  0x1a   : > { %2870 = sst [smem:[#allocation18_spill]] %s2869_s20  ;;  %s483_s2 = sshll.u32 %s2347_s22, 4  ;;  %s484_s2 = int_to_ptr.vmem [resolvable:$true] %s483_s2 }
  0x1b   : > { %p2059_p9 = pneg %p2502_p8  ;;  %s2348_s24 = smov [#allocation7]  }
  0x1c   : > { %s499_s25 = sshll.u32 %s2348_s24, 4  ;;  %s2349_s26 = smov [#allocation8]   ;;  %s500_s25 = int_to_ptr.vmem [resolvable:$true] %s499_s25 }
  0x1d   : > { %p2511_p11 = pnand %p2059_p9, %p2849_p1  ;;  %s521_s19 = sshll.u32 %s2349_s26, 4  ;;  %s522_s19 = int_to_ptr.vmem [resolvable:$true] %s521_s19 }
  0x1e   : > { %s2178_s20 = scalar_lea.vmem %s484_s2, 256  ;;  %p2186_p5 = scmp.lt.s32.totalorder %s484_s2, %s484_s2 }
  0x1f   : > { %p2169_p12 = pneg %p2511_p11  ;;  %p2179_p13 = scmp.ne.s32.totalorder %s484_s2, %s2178_s20 }
  0x20   : > { %p2187_p7 = scmp.lt.s32.totalorder %s2178_s20, %s2178_s20 }
  0x21   : > { %p2181_p0 = pnand %p2179_p13, %p2169_p12 }
  0x22   : > { %p2188_p9 = por %p2187_p7, %p2186_p5 }
  0x23   : > { %p2182_p3 = pneg %p2181_p0 }
  0x25   : > { %p2189_p10 = pnand %p2188_p9, %p2182_p3 }
  0x27   : > { %2192 = shalt.err (!%p2189_p10)
}
  0x28   : > { %s2350_s22 = smov 64   ;;  %s2351_s24 = smov 4  }
  0x29   : > { %s2873_s6 = sld [smem:[#allocation24_spill]]  ;;  %s2204_s18 = scalar_lea.vmem %s500_s25, 256 }
  0x2a   : > { %p2205_p1 = scmp.ne.s32.totalorder %s500_s25, %s2204_s18  ;;  %p2212_p2 = scmp.lt.s32.totalorder %s500_s25, %s500_s25 }
  0x2b   : > { %p2213_p6 = scmp.lt.s32.totalorder %s2204_s18, %s2204_s18 }
  0x2c   : > { %p2207_p13 = pnand %p2205_p1, %p2169_p12 }
  0x2d   : > { %p2214_p5 = por %p2213_p6, %p2212_p2 }
  0x2e   : > { %p2208_p0 = pneg %p2207_p13 }
  0x2f   : > { %2062 = dma.hbm_to_vmem [thread:$0]  (!%p2511_p11), %s2873_s6, 256, %s484_s2, [#allocation6], %s2350_s22, %s2350_s22, %s2351_s24  }
  0x30   : > { %p2215_p3 = pnand %p2214_p5, %p2208_p0 }
  0x32   : > { %2218 = shalt.err (!%p2215_p3)
}
  0x33   : > { %s2874_s8 = sld [smem:[#allocation25_spill]]  ;;  %s2230_s27 = scalar_lea.vmem %s522_s19, 256 }
  0x34   : > { %p2231_p10 = scmp.ne.s32.totalorder %s522_s19, %s2230_s27  ;;  %p2238_p9 = scmp.lt.s32.totalorder %s522_s19, %s522_s19 }
  0x35   : > { %p2239_p13 = scmp.lt.s32.totalorder %s2230_s27, %s2230_s27 }
  0x36   : > { %p2233_p7 = pnand %p2231_p10, %p2169_p12 }
  0x37   : > { %p2240_p4 = por %p2239_p13, %p2238_p9 }
  0x38   : > { %p2234_p1 = pneg %p2233_p7 }
  0x39   : > { %2065 = dma.hbm_to_vmem [thread:$0]  (!%p2511_p11), %s2874_s8, 256, %s500_s25, [#allocation6], %s2350_s22, %s2350_s22, %s2351_s24  }
  0x3a   : > { %p2241_p2 = pnand %p2240_p4, %p2234_p1 }
  0x3c   : > { %2244 = shalt.err (!%p2241_p2)
}
  0x3d   : > { %s2875_s12 = sld [smem:[#allocation26_spill]]  ;;  %s2542_s17 = sadd.s32 1, %s2345_s30  }
  0x3e   : > { %2876 = sst [smem:[#allocation19_spill]] %s2542_s17  ;;  %s66_s25 = ssub.s32 %s2345_s30, %s2542_s17 }
  0x3f   : > { %s69_s23 = sadd.s32 1, %s2341_s29  ;;  %p67_p4 = scmp.eq.s32.totalorder %s66_s25, 0 }
  0x40   : > { %p76_p6 = scmp.ne.s32.totalorder %s2341_s29, %s2337_s28  ;;  %p77_p12 = scmp.eq.s32.totalorder %s2345_s30, 0 }
  0x41   : > { %p2080_p0 = scmp.lt.s32.totalorder %s2345_s30, 2  ;;  %p2878_p3 = scmp.eq.s32.totalorder %s2483_s0, 1 }
  0x42   : > { %s2552_s26 = scalar_select %p67_p4, %s2341_s29, %s69_s23  }
  0x43   : > { %2068 = dma.hbm_to_vmem [thread:$0]  (!%p2511_p11), %s2875_s12, 256, %s522_s19, [#allocation9], %s2350_s22, %s2350_s22, %s2351_s24  }
  0x44   : > { %2877 = sst [smem:[#allocation20_spill]] %s2552_s26  ;;  %p78_p5 = por %p77_p12, %p76_p6 }
  0x45   : > { %p2556_p10 = por %p2878_p3, %p76_p6  ;;  %s557_s27 = sand.u32 1, %s2341_s29  }
  0x46   : > { %s1848_s18 = sshll.u32 %s2345_s30, 4  ;;  %s2880_s24 = sld [smem:[#allocation22_spill]] }
  0x47   : > { %s2879_s20 = scalar_select %p2556_p10, 1, 0 }
  0x48   : > { %s560_s25 = scalar_lea.vmem [#allocation2], %s557_s27  ;;  %p2567_p11 = pnand %p2080_p0, %p78_p5 }
  0x49   : > { %s567_s6 = sshll.u32 %s560_s25, 4  ;;  %s558_s8 = scalar_lea.sflag [#allocation3], %s557_s27  ;;  %s568_s6 = int_to_ptr.vmem [resolvable:$true] %s567_s6 }
  0x4a   : > { %p2247_p1 = pneg %p2567_p11 }
  0x4c   : > { %s2565_s2 = scalar_lea.hbm %s2880_s24, %s1848_s18  ;;  %s2250_s22 = scalar_lea.hbm %s2880_s24, 32 }
  0x4d   : > { %s2245_s12 = scalar_lea.hbm %s2565_s2, 16  ;;  %p2251_p2 = scmp.lt.s32.totalorder %s2565_s2, %s2880_s24 }
  0x4e   : > { %p2246_p7 = scmp.ne.s32.totalorder %s2565_s2, %s2245_s12  ;;  %p2252_p4 = scmp.lt.s32.totalorder %s2250_s22, %s2245_s12 }
  0x50   : > { %p2248_p9 = pnand %p2247_p1, %p2246_p7  ;;  %p2253_p6 = por %p2252_p4, %p2251_p2 }
  0x52   : > { %p2249_p13 = pneg %p2248_p9 }
  0x54   : > { %p2254_p12 = pnand %p2253_p6, %p2249_p13 }
  0x56   : > { %2257 = shalt.err (!%p2254_p12)
}
  0x57   : > { %s2258_s25 = scalar_lea.vmem %s568_s6, 16  ;;  %s2352_s27 = smov [#allocation2]  }
  0x58   : > { %p2259_p0 = scmp.ne.s32.totalorder %s568_s6, %s2258_s25  ;;  %s2263_s17 = sshll.u32 %s2352_s27, 4  ;;  %s2264_s17 = int_to_ptr.vmem [resolvable:$false] %s2263_s17 }
  0x59   : > { %s2265_s30 = scalar_lea.vmem %s2264_s17, 32  ;;  %p2266_p7 = scmp.lt.s32.totalorder %s568_s6, %s2264_s17 }
  0x5a   : > { %p2261_p5 = pnand %p2259_p0, %p2247_p1  ;;  %p2267_p9 = scmp.lt.s32.totalorder %s2265_s30, %s2258_s25 }
  0x5c   : > { %p2262_p3 = pneg %p2261_p5  ;;  %p2268_p10 = por %p2267_p9, %p2266_p7 }
  0x5e   : > { %p2269_p8 = pnand %p2268_p10, %p2262_p3 }
  0x60   : > { %2272 = shalt.err (!%p2269_p8)
}
  0x61   : > { %2072 = dma.hbm_to_vmem [thread:$0]  (!%p2567_p11), %s2565_s2, 16, %s568_s6, %s558_s8  }
  0x62   : > { %p2882_p13 = scmp.ne.s32.totalorder %s2871_s21, 0 }
  0x63   : > { %s2588_s12 = sand.u32 (!%p2882_p13), 1, %s2337_s28   ;;  %p2883_p1 = scmp.ne.s32.totalorder (!%p2882_p13), %s2868_s1, 0 }
  0x64   : > { %589 = sbr.rel (%p2882_p13) target bundleno = 3826 (0xef2), region = 92  ;;  %s592_s29 = scalar_lea.sflag (!%p2882_p13), [#allocation3], %s2588_s12 }
  0x65   : > { %s594_s26 = scalar_lea.vmem (!%p2882_p13), [#allocation2], %s2588_s12 }
  0x69   : > { %2316 = dma.done.wait (%p2883_p1), %s592_s29, 16  }
  0x6a   : > { %2318 = vsyncadd (%p2883_p1), %s592_s29, 4294967280  ;;  %p2884_p8 = scmp.eq.s32.totalorder %s2483_s0, 0 }
  0x6c   : > { %2320 = dma.done.wait (%p2884_p8), [#allocation6], 512   ;;  %p2885_p10 = pmov %p2884_p8 }
  0x6d   : > { %p2886_p11 = pmov %p2884_p8 }
  0x6e   : > { %2322 = vsyncadd (%p2885_p10), [#allocation6], 4294966784 }
  0x6f   : > { %2324 = dma.done.wait (%p2886_p11), [#allocation9], 256   ;;  %p2887_p2 = pmov %p2884_p8 }
  0x70   : > { %p669_p4 = scmp.lt.s32.totalorder %s2483_s0, 1  ;;  %v2353_v0 = vmov 0.0   ;;  %vm2354_vm0 = vmmov 0   ;;  %s2888_s21 = sld [smem:[#allocation23_spill]]  ;;  %v2135_v1 = vld [vmem:[%s2829_s3 + $0x8] sm:$0xff]   ;;  %v2136_v2 = vld [vmem:[%s2829_s3] sm:$0xff]  }
  0x71   : > { %2326 = vsyncadd (%p2887_p2), [#allocation9], 4294967040  ;;  %1935 = vmatprep.subr.bf16.mxu0 %v2353_v0  ;;  %1939 = vmatprep.mubr.msk.bf16.mxu0 %vm2354_vm0, %v2353_v0  ;;  %vm715_vm1 = vcmask 261120   ;;  %v2137_v5 = vld [vmem:[#allocation5 + $0x8] sm:$0xff]   ;;  %v2138_v6 = vld [vmem:[#allocation5] sm:$0xff]   ;;  %s2889_s27 = sld [smem:[#allocation21_spill]] }
  0x72   : > { %s2609_s6 = scalar_select %p669_p4, %s2483_s0, 1  ;;  %1943 = vmatprep.subr.bf16.mxu1 %v2353_v0  ;;  %1947 = vmatprep.mubr.msk.bf16.mxu1 %vm2354_vm0, %v2353_v0  ;;  %v1856_v8 = vld [vmem:[%s594_s26] ss:$0 sm:$0xff]  ;;  %vm840_vm2 = vcmask 64512   ;;  %vm904_vm3 = vcmask 1043456   ;;  %vm1624_vm4 = vcmask 523264  }
  0x73   : > { %1936 = vmatpush3.bf16.msra.mxu0 %v2135_v1  ;;  %1944 = vmatpush3.bf16.msra.mxu1 %v2137_v5  ;;  %v1857_v9 = vld [vmem:[%s2830_s4] ss:$0 sm:$0xff]  ;;  %s2357_s2 = smov 88   ;;  %s2359_s22 = smov 56  }
  0x74   : > { %s1854_s8 = sshll.u32 %s2609_s6, 3  ;;  %1937 = vmatprep.subr.bf16.mxu0 %v2353_v0  ;;  %1945 = vmatprep.subr.bf16.mxu1 %v2353_v0  ;;  %v1861_v18 = vld [vmem:[%s2833_s7] ss:$0 sm:$0xff]  ;;  %s679_s19 = scalar_lea.vmem %s2831_s5, %s2609_s6 }
  0x75   : > { %v2671_v32 = vld [vmem:[%s679_s19] ss:$0 sm:$0xff]  ;;  %s2358_s6 = smov 64   ;;  %s2360_s25 = smov 112  }
  0x76   : > { %s676_s17 = scalar_lea.vmem %s2888_s21, %s1854_s8  ;;  %s2355_s21 = smov 96  }
  0x77   : > { %v690_v3 = vld [vmem:[%s676_s17] sm:$0xff]  ;;  %1938 = vmatpush3.bf16.msra.mxu0 %v2136_v2  ;;  %1946 = vmatpush3.bf16.msra.mxu1 %v2138_v6  ;;  %s672_s29 = scalar_lea.vmem %s2889_s27, %s1854_s8  ;;  %s2356_s17 = smov 120   ;;  %v1062_v6 = vld [vmem:[#allocation7 + $0x4] sm:$0xf] }
  0x78   : > { %v691_v4 = vpack.c.bf16 %v690_v3, %v690_v3  ;;  %1951 = vmatprep.subr.bf16.mxu0 %v2353_v0  ;;  %1957 = vmatprep.subr.bf16.mxu1 %v2353_v0  ;;  %v681_v7 = vld [vmem:[%s672_s29] sm:$0xff]  ;;  %s2361_s27 = smov 80   ;;  %s2362_s29 = smov 72  }
  0x79   : > { %v689_v10 = vadd.f32 %v1856_v8, %v681_v7  ;;  %v1067_v7 = vsel %vm904_vm3, %v1062_v6, 0  ;;  %s2363_s30 = smov 104   ;;  %s2364_s1 = smov 48  }
  0x7a   : > { %1940 = vmatmul.mubr.msk.bf16.vlgmr.msra.gmra.mxu0 %vm715_vm1, %v691_v4  ;;  %v949_v4 = vld [vmem:[#allocation7] sm:$0xf]  ;;  %s2365_s26 = smov 40   ;;  %p2892_p12 = scmp.ne.s32.totalorder %s2879_s20, 0 }
  0x7b   : > { %1953 = vmatprep.mubr.msk.bf16.mxu0 %vm2354_vm0, %v2353_v0  ;;  %v1113_v5 = vsel %vm904_vm3, %v949_v4, 0  ;;  %s2366_s23 = smov [#allocation10]  }
  0x7c   : > { %s2277_s18 = sshll.u32 %s2366_s23, 4  ;;  %s2278_s18 = int_to_ptr.vmem [resolvable:$false] %s2277_s18 }
 0x13a   : > { %v753_v11 = vpop.f32.mrf.mxu0 }
 0x13b   : > { %v754_v12 = vadd.f32 %v1857_v9, %v753_v11 }
 0x13c   : > { %v1941_v13 = vpop.f32.mrf.mxu0 }
 0x13d   : > { %v2639_v14 = vadd.f32 %v754_v12, %v689_v10 }
 0x13e   : > { %v756_v15 = vpop.f32.mrf.mxu0 }
 0x13f   : > { %v760_v16 = vpack.c.bf16 %v2639_v14, %v2639_v14 }
 0x140   : > { %v1942_v17 = vpop.f32.mrf.mxu0 }
 0x141   : > { %1948 = vmatmul.mubr.msk.bf16.vlgmr.msra.gmra.mxu1 %vm715_vm1, %v760_v16 }
 0x142   : > { %1959 = vmatprep.mubr.msk.bf16.mxu1 %vm2354_vm0, %v2353_v0 }
 0x201   : > { %v821_v19 = vpop.f32.mrf.mxu1 }
 0x202   : > { %v822_v20 = vadd.f32 %v1861_v18, %v821_v19 }
 0x203   : > { %v1949_v21 = vpop.f32.mrf.mxu1 }
 0x204   : > { %v827_v22 = vmul.f32 0.35355338, %v822_v20  ;;  %v2649_v23 = vpack.c.bf16 %v822_v20, %v822_v20 }
 0x205   : > { %v824_v24 = vpop.f32.mrf.mxu1 }
 0x206   : > { %v2651_v25 = vpack.c.bf16 %v827_v22, %v827_v22  ;;  %838 = vrot.lane.b32.xlu0 %v2649_v23, %s2355_s21  ;;  %s1700_s21 = scalar_lea.sflag [#allocation4], %s2588_s12 }
 0x207   : > { %v1950_v26 = vpop.f32.mrf.mxu1 }
 0x208   : > { %951 = vrot.lane.b32.xlu1 %v2651_v25, %s2356_s17 }
 0x20a   : > { %953 = vrot.lane.b32.xlu0 %v2649_v23, %s2357_s2  ;;  %s1853_s2 = sshll.u32 %s2588_s12, 3 }
 0x278   : > { %v839_v27 = vpop.permute.xlu0 %838 }
 0x279   : > { %v845_v28 = vsel %vm840_vm2, %v839_v27, 0 }
 0x27a   : > { %1952 = vmatpush3.bf16.xpose.msra.mxu0 %v845_v28  ;;  %v952_v31 = vpop.permute.xlu1 %951 }
 0x27b   : > { %1963 = vmatprep.subr.bf16.mxu0 %v2353_v0 }
 0x27c   : > { %v954_v29 = vpop.permute.xlu0 %953 }
 0x27d   : > { %v959_v30 = vsel %vm840_vm2, %v954_v29, 0 }
 0x281   : > { %1954 = vmatmul.mubr.msk.bf16.vlgmr.msra.gmra.mxu0 %vm840_vm2, %v2651_v25 }
 0x282   : > { %1964 = vmatpush3.bf16.xpose.msra.mxu0 %v959_v30  ;;  %1965 = vmatprep.mubr.msk.bf16.mxu0 %vm2354_vm0, %v2353_v0 }
 0x283   : > { %1975 = vmatprep.subr.bf16.mxu0 %v2353_v0 }
 0x289   : > { %1966 = vmatmul.mubr.msk.bf16.vlgmr.msra.gmra.mxu0 %vm840_vm2, %v952_v31 }
 0x28a   : > { %1977 = vmatprep.mubr.msk.bf16.mxu0 %vm2354_vm0, %v2353_v0  ;;  %1976 = vmatpush3.bf16.msra.mxu0 %v1067_v7 }
 0x28b   : > { %1987 = vmatprep.subr.bf16.mxu0 %v2353_v0 }
 0x341   : > { %v881_v33 = vpop.f32.mrf.mxu0 }
 0x342   : > { %v882_v34 = vadd.f32 %v2671_v32, %v881_v33 }
 0x343   : > { %v1955_v35 = vpop.f32.mrf.mxu0 }
 0x344   : > { %v887_v36 = vsel %vm840_vm2, %v882_v34, -inf }
 0x345   : > { %888 = vmax.xlane.f32.xlu1 %v887_v36  ;;  %v884_v37 = vpop.f32.mrf.mxu0 }
 0x347   : > { %v1956_v38 = vpop.f32.mrf.mxu0 }
 0x349   : > { %v995_v39 = vpop.f32.mrf.mxu0 }
 0x34a   : > { %v996_v40 = vadd.f32 %v2671_v32, %v995_v39 }
 0x34b   : > { %v1967_v41 = vpop.f32.mrf.mxu0 }
 0x34c   : > { %v1001_v42 = vsel %vm840_vm2, %v996_v40, -inf }
 0x34d   : > { %1002 = vmax.xlane.f32.xlu0 %v1001_v42  ;;  %v998_v43 = vpop.f32.mrf.mxu0 }
 0x34f   : > { %v1968_v44 = vpop.f32.mrf.mxu0 }
 0x3ce   : > { %v889_v45 = vpop.xlane.xlu1 %888 }
 0x3cf   : > { %v890_v46 = vsub.f32 %v882_v34, %v889_v45 }
 0x3d1   : > { %v891_v47 = vmul.f32 1.442695, %v890_v46 }
 0x3d3   : > { %2145 = vpow2.f32 %v891_v47 }
 0x3d6   : > { %v1003_v48 = vpop.xlane.xlu0 %1002 }
 0x3d7   : > { %v1004_v49 = vsub.f32 %v996_v40, %v1003_v48 }
 0x3d9   : > { %v1005_v50 = vmul.f32 1.442695, %v1004_v49 }
 0x3db   : > { %2147 = vpow2.f32 %v1005_v50 }
 0x3e0   : > { %v2146_v51 = vpop.eup %2145 }
 0x3e1   : > { %v893_v52 = vsel %vm840_vm2, %v2146_v51, 0.0 }
 0x3e2   : > { %894 = vadd.xlane.f32.xlu0 %v893_v52 }
 0x3e8   : > { %v2148_v53 = vpop.eup %2147 }
 0x3e9   : > { %v1007_v54 = vsel %vm840_vm2, %v2148_v53, 0.0 }
 0x3ea   : > { %1008 = vadd.xlane.f32.xlu1 %v1007_v54 }
 0x3f8   : > { %899 = vrot.lane.b32.xlu0 %v2649_v23, %s2358_s6 }
 0x3fb   : > { %1013 = vrot.lane.b32.xlu1 %v2649_v23, %s2359_s22  ;;  %s2890_s22 = sld [smem:[#allocation27_spill]] }
 0x3fc   : > { %1155 = vrot.lane.b32.xlu0 %v2651_v25, %s2360_s25  ;;  %s1894_s25 = sshll.u32 %s2483_s0, 7  ;;  %s2279_s0 = scalar_lea.vmem %s2278_s18, 256 }
 0x3ff   : > { %1157 = vrot.lane.b32.xlu1 %v2649_v23, %s2361_s27  ;;  %s668_s27 = scalar_lea.vmem [#allocation10], %s1853_s2 }
 0x46b   : > { %v895_v55 = vpop.xlane.xlu0 %894 }
 0x46c   : > { %2149 = vrcp.f32 %v895_v55 }
 0x46f   : > { %v900_v56 = vpop.permute.xlu0 %899 }
 0x470   : > { %v906_v57 = vsel %vm904_vm3, %v900_v56, 0 }
 0x471   : > { %1958 = vmatpush3.bf16.msra.mxu1 %v906_v57 }
 0x472   : > { %1969 = vmatprep.subr.bf16.mxu1 %v2353_v0 }
 0x473   : > { %v1009_v58 = vpop.xlane.xlu1 %1008  ;;  %v1156_v21 = vpop.permute.xlu0 %1155 }
 0x474   : > { %2151 = vrcp.f32 %v1009_v58 }
 0x477   : > { %v1014_v61 = vpop.permute.xlu1 %1013 }
 0x478   : > { %v1019_v63 = vsel %vm904_vm3, %v1014_v61, 0 }
 0x479   : > { %v2150_v59 = vpop.eup %2149 }
 0x47a   : > { %v897_v60 = vmul.f32 %v2150_v59, %v2146_v51 }
 0x47b   : > { %v1158_v13 = vpop.permute.xlu1 %1157 }
 0x47c   : > { %v898_v62 = vpack.c.bf16 %v897_v60, %v897_v60  ;;  %v1163_v18 = vsel %vm840_vm2, %v1158_v13, 0 }
 0x47e   : > { %1960 = vmatmul.mubr.msk.bf16.vlgmr.msra.gmra.mxu1 %vm840_vm2, %v898_v62 }
 0x47f   : > { %1970 = vmatpush3.bf16.msra.mxu1 %v1019_v63  ;;  %1971 = vmatprep.mubr.msk.bf16.mxu1 %vm2354_vm0, %v2353_v0 }
 0x480   : > { %1981 = vmatprep.subr.bf16.mxu1 %v2353_v0 }
 0x481   : > { %v2152_v1 = vpop.eup %2151 }
 0x482   : > { %v1011_v2 = vmul.f32 %v2152_v1, %v2148_v53  ;;  %v1266_v53 = vld [vmem:[#allocation7 + $0x8] sm:$0xf] }
 0x483   : > { %v1271_v54 = vsel %vm904_vm3, %v1266_v53, 0  ;;  %v2142_v53 = vld [vmem:[%s2840_s14 + $0x10] sm:$0xff]  }
 0x484   : > { %v1012_v3 = vpack.c.bf16 %v1011_v2, %v1011_v2 }
 0x486   : > { %1972 = vmatmul.mubr.msk.bf16.vlgmr.msra.gmra.mxu1 %vm840_vm2, %v1012_v3 }
 0x487   : > { %1983 = vmatprep.mubr.msk.bf16.mxu1 %vm2354_vm0, %v2353_v0  ;;  %1982 = vmatpush3.bf16.msra.mxu1 %v1113_v5 }
 0x488   : > { %1993 = vmatprep.subr.bf16.mxu1 %v2353_v0 }
 0x53e   : > { %v942_v8 = vpop.f32.mrf.mxu1 }
 0x53f   : > { %v948_v9 = vpack.c.bf16 %v942_v8, %v942_v8 }
 0x540   : > { %v1961_v10 = vpop.f32.mrf.mxu1 }
 0x541   : > { %1984 = vmatmul.mubr.msk.bf16.vlgmr.msra.gmra.mxu1 %vm840_vm2, %v948_v9 }
 0x542   : > { %v945_v11 = vpop.f32.mrf.mxu1  ;;  %1995 = vmatprep.mubr.msk.bf16.mxu1 %vm2354_vm0, %v2353_v0 }
 0x544   : > { %v1962_v12 = vpop.f32.mrf.mxu1 }
 0x545   : > { %v1425_v12 = vld [vmem:[#allocation7 + $0xc] sm:$0xf] }
 0x546   : > { %v1055_v15 = vpop.f32.mrf.mxu1 }
 0x547   : > { %v1061_v16 = vpack.c.bf16 %v1055_v15, %v1055_v15 }
 0x548   : > { %v1973_v17 = vpop.f32.mrf.mxu1 }
 0x549   : > { %1978 = vmatmul.mubr.msk.bf16.vlgmr.msra.gmra.mxu0 %vm840_vm2, %v1061_v16 }
 0x54a   : > { %1988 = vmatpush3.bf16.xpose.msra.mxu0 %v1163_v18  ;;  %v1058_v19 = vpop.f32.mrf.mxu1  ;;  %1989 = vmatprep.mubr.msk.bf16.mxu0 %vm2354_vm0, %v2353_v0 }
 0x54b   : > { %1999 = vmatprep.subr.bf16.mxu0 %v2353_v0 }
 0x54c   : > { %v1974_v20 = vpop.f32.mrf.mxu1 }
 0x551   : > { %1990 = vmatmul.mubr.msk.bf16.vlgmr.msra.gmra.mxu0 %vm840_vm2, %v1156_v21 }
 0x552   : > { %2001 = vmatprep.mubr.msk.bf16.mxu0 %vm2354_vm0, %v2353_v0  ;;  %2000 = vmatpush3.bf16.msra.mxu0 %v1271_v54  ;;  %v2143_v54 = vld [vmem:[%s2840_s14 + $0x8] sm:$0xff]  }
 0x553   : > { %2011 = vmatprep.subr.bf16.mxu0 %v2353_v0 }
 0x601   : > { %v1149_v22 = vpop.f32.mrf.mxu1 }
 0x603   : > { %v1985_v24 = vpop.f32.mrf.mxu1 }
 0x605   : > { %v1152_v26 = vpop.f32.mrf.mxu1 }
 0x607   : > { %v1986_v27 = vpop.f32.mrf.mxu1 }
 0x609   : > { %v1103_v28 = vpop.f32.mrf.mxu0 }
 0x60a   : > { %v2708_v29 = vadd.f32 %v1149_v22, %v1103_v28  ;;  %v1878_v28 = vld [vmem:[%s2835_s9] ss:$0 sm:$0xff] }
 0x60b   : > { %v1979_v30 = vpop.f32.mrf.mxu0 }
 0x60d   : > { %v1106_v31 = vpop.f32.mrf.mxu0 }
 0x60f   : > { %v1980_v33 = vpop.f32.mrf.mxu0 }
 0x611   : > { %v1199_v34 = vpop.f32.mrf.mxu0 }
 0x612   : > { %v1200_v35 = vadd.f32 %v2671_v32, %v1199_v34 }
 0x613   : > { %v1991_v36 = vpop.f32.mrf.mxu0 }
 0x614   : > { %v1205_v37 = vsel %vm840_vm2, %v1200_v35, -inf }
 0x615   : > { %1206 = vmax.xlane.f32.xlu1 %v1205_v37  ;;  %v1202_v38 = vpop.f32.mrf.mxu0 }
 0x617   : > { %v1992_v39 = vpop.f32.mrf.mxu0 }
 0x626   : > { %1316 = vrot.lane.b32.xlu1 %v2649_v23, %s2362_s29  ;;  %s1713_s29 = sshll.u32 %s668_s27, 4  ;;  %s1714_s29 = int_to_ptr.vmem [resolvable:$true] %s1713_s29 }
 0x627   : > { %s2273_s17 = scalar_lea.vmem %s1714_s29, 128  ;;  %p2280_p3 = scmp.lt.s32.totalorder %s1714_s29, %s2278_s18 }
 0x628   : > { %p2274_p6 = scmp.ne.s32.totalorder %s1714_s29, %s2273_s17  ;;  %p2281_p7 = scmp.lt.s32.totalorder %s2279_s0, %s2273_s17 }
 0x62a   : > { %1314 = vrot.lane.b32.xlu1 %v2651_v25, %s2363_s30  ;;  %p2275_p0 = pnand %p2274_p6, %p2892_p12  ;;  %p2282_p9 = por %p2281_p7, %p2280_p3 }
 0x62c   : > { %p2276_p5 = pneg %p2275_p0 }
 0x62e   : > { %p2283_p13 = pnand %p2282_p9, %p2276_p5 }
 0x69e   : > { %v1207_v40 = vpop.xlane.xlu1 %1206 }
 0x69f   : > { %v1208_v41 = vsub.f32 %v1200_v35, %v1207_v40 }
 0x6a1   : > { %v1209_v42 = vmul.f32 1.442695, %v1208_v41 }
 0x6a2   : > { %v1317_v49 = vpop.permute.xlu1 %1316 }
 0x6a3   : > { %2153 = vpow2.f32 %v1209_v42  ;;  %v1322_v51 = vsel %vm840_vm2, %v1317_v49, 0  ;;  %v2139_v42 = vld [vmem:[#allocation8 + $0x8] sm:$0xff]  }
 0x6a6   : > { %v1315_v52 = vpop.permute.xlu1 %1314 }
 0x6b0   : > { %v2154_v43 = vpop.eup %2153 }
 0x6b1   : > { %v1211_v44 = vsel %vm840_vm2, %v2154_v43, 0.0 }
 0x6b2   : > { %1212 = vadd.xlane.f32.xlu0 %v1211_v44 }
 0x6c8   : > { %1217 = vrot.lane.b32.xlu0 %v2649_v23, %s2364_s1 }
 0x73b   : > { %v1213_v45 = vpop.xlane.xlu0 %1212 }
 0x73c   : > { %2155 = vrcp.f32 %v1213_v45 }
 0x73f   : > { %v1218_v46 = vpop.permute.xlu0 %1217 }
 0x740   : > { %v1223_v47 = vsel %vm904_vm3, %v1218_v46, 0 }
 0x741   : > { %1994 = vmatpush3.bf16.msra.mxu1 %v1223_v47  ;;  %v1879_v47 = vld [vmem:[%s2836_s10] ss:$0 sm:$0xff] }
 0x742   : > { %2005 = vmatprep.subr.bf16.mxu1 %v2353_v0 }
 0x749   : > { %v2156_v25 = vpop.eup %2155 }
 0x74a   : > { %v1215_v48 = vmul.f32 %v2156_v25, %v2154_v43  ;;  %v2140_v43 = vld [vmem:[#allocation8] sm:$0xff]  }
 0x74c   : > { %v1216_v50 = vpack.c.bf16 %v1215_v48, %v1215_v48  ;;  %v1880_v48 = vld [vmem:[%s2837_s11] ss:$0 sm:$0xff] }
 0x74e   : > { %1996 = vmatmul.mubr.msk.bf16.vlgmr.msra.gmra.mxu1 %vm840_vm2, %v1216_v50 }
 0x74f   : > { %2006 = vmatpush3.bf16.xpose.msra.mxu1 %v1322_v51  ;;  %2007 = vmatprep.mubr.msk.bf16.mxu1 %vm2354_vm0, %v2353_v0 }
 0x750   : > { %2017 = vmatprep.subr.bf16.mxu1 %v2353_v0 }
 0x756   : > { %2008 = vmatmul.mubr.msk.bf16.vlgmr.msra.gmra.mxu1 %vm840_vm2, %v1315_v52  ;;  %v2141_v52 = vld [vmem:[%s2840_s14 + $0x18] sm:$0xff]  }
 0x757   : > { %2019 = vmatprep.mubr.msk.bf16.mxu1 %vm2354_vm0, %v2353_v0 }
 0x80e   : > { %v1259_v55 = vpop.f32.mrf.mxu1 }
 0x80f   : > { %v1265_v56 = vpack.c.bf16 %v1259_v55, %v1259_v55  ;;  %v2144_v55 = vld [vmem:[%s2840_s14] sm:$0xff]  }
 0x810   : > { %v1997_v57 = vpop.f32.mrf.mxu1 }
 0x811   : > { %2002 = vmatmul.mubr.msk.bf16.vlgmr.msra.gmra.mxu0 %vm840_vm2, %v1265_v56  ;;  %v1881_v56 = vld [vmem:[%s2839_s13] ss:$0 sm:$0xff] }
 0x812   : > { %v1262_v58 = vpop.f32.mrf.mxu1  ;;  %2013 = vmatprep.mubr.msk.bf16.mxu0 %vm2354_vm0, %v2353_v0 }
 0x814   : > { %v1998_v59 = vpop.f32.mrf.mxu1 }
 0x816   : > { %v1358_v60 = vpop.f32.mrf.mxu1 }
 0x817   : > { %v1359_v61 = vadd.f32 %v2671_v32, %v1358_v60 }
 0x818   : > { %v2009_v62 = vpop.f32.mrf.mxu1 }
 0x819   : > { %v1364_v63 = vsel %vm840_vm2, %v1359_v61, -inf }
 0x81a   : > { %1365 = vmax.xlane.f32.xlu0 %v1364_v63  ;;  %v1361_v1 = vpop.f32.mrf.mxu1 }
 0x81c   : > { %v2010_v2 = vpop.f32.mrf.mxu1 }
 0x830   : > { %1376 = vrot.lane.b32.xlu0 %v2649_v23, %s2365_s26  ;;  %v1430_v23 = vsel %vm904_vm3, %v1425_v12, 0  ;;  %s2891_s26 = sld [smem:[#allocation28_spill]] }
 0x831   : > { %2018 = vmatpush3.bf16.msra.mxu1 %v1430_v23 }
 0x832   : > { %2031 = vmatprep.subr.bf16.mxu1 %v2353_v0 }
 0x836   : > { %s1711_s8 = scalar_lea.hbm %s2891_s26, %s1894_s25 }
 0x8a3   : > { %v1366_v3 = vpop.xlane.xlu0 %1365 }
 0x8a4   : > { %v1367_v4 = vsub.f32 %v1359_v61, %v1366_v3 }
 0x8a6   : > { %v1368_v5 = vmul.f32 1.442695, %v1367_v4  ;;  %v1885_v4 = vld [vmem:[%s2841_s15] ss:$0 sm:$0xff] }
 0x8a7   : > { %v1377_v6 = vpop.permute.xlu0 %1376 }
 0x8a8   : > { %2157 = vpow2.f32 %v1368_v5  ;;  %v1382_v7 = vsel %vm904_vm3, %v1377_v6, 0 }
 0x8a9   : > { %2012 = vmatpush3.bf16.msra.mxu0 %v1382_v7 }
 0x8aa   : > { %2023 = vmatprep.subr.bf16.mxu0 %v2353_v0 }
 0x8b5   : > { %v2158_v32 = vpop.eup %2157 }
 0x8b6   : > { %v1370_v8 = vsel %vm840_vm2, %v2158_v32, 0.0 }
 0x8b7   : > { %1371 = vadd.xlane.f32.xlu1 %v1370_v8 }
 0x8d1   : > { %v1307_v9 = vpop.f32.mrf.mxu0 }
 0x8d2   : > { %v1313_v10 = vadd.f32 %v1307_v9, %v2708_v29 }
 0x8d3   : > { %v2003_v11 = vpop.f32.mrf.mxu0 }
 0x8d5   : > { %v1310_v13 = vpop.f32.mrf.mxu0 }
 0x8d7   : > { %v2004_v15 = vpop.f32.mrf.mxu0 }
 0x940   : > { %v1372_v16 = vpop.xlane.xlu1 %1371 }
 0x941   : > { %2159 = vrcp.f32 %v1372_v16 }
 0x94e   : > { %v2160_v17 = vpop.eup %2159 }
 0x94f   : > { %v1374_v18 = vmul.f32 %v2160_v17, %v2158_v32 }
 0x951   : > { %v1375_v19 = vpack.c.bf16 %v1374_v18, %v1374_v18 }
 0x953   : > { %2014 = vmatmul.mubr.msk.bf16.vlgmr.msra.gmra.mxu0 %vm840_vm2, %v1375_v19 }
 0x954   : > { %2027 = vmatprep.mubr.msk.bf16.mxu0 %vm2354_vm0, %v2353_v0  ;;  %2024 = vmatpush3.bf16.msra.mxu0 %v2139_v42 }
 0x955   : > { %2025 = vmatprep.subr.bf16.mxu0 %v2353_v0 }
 0x958   : > { %2026 = vmatpush3.bf16.msra.mxu0 %v2140_v43 }
 0xa13   : > { %v1418_v20 = vpop.f32.mrf.mxu0 }
 0xa14   : > { %v1424_v21 = vpack.c.bf16 %v1418_v20, %v1418_v20  ;;  %v1891_v20 = vld [vmem:[%s2842_s16] ss:$0 sm:$0xff] }
 0xa15   : > { %v2015_v22 = vpop.f32.mrf.mxu0 }
 0xa16   : > { %2020 = vmatmul.mubr.msk.bf16.vlgmr.msra.gmra.mxu1 %vm840_vm2, %v1424_v21  ;;  %v1892_v22 = vld [vmem:[%s2890_s22] ss:$0 sm:$0xff] }
 0xa17   : > { %v1421_v24 = vpop.f32.mrf.mxu0  ;;  %2039 = vmatprep.mubr.msk.bf16.mxu1 %vm2354_vm0, %v2353_v0  ;;  %2032 = vmatpush3.bf16.msra.mxu1 %v2141_v52 }
 0xa18   : > { %2033 = vmatprep.subr.bf16.mxu1 %v2353_v0 }
 0xa19   : > { %v2016_v26 = vpop.f32.mrf.mxu0 }
 0xa1b   : > { %2034 = vmatpush3.bf16.msra.mxu1 %v2142_v53 }
 0xa1c   : > { %2035 = vmatprep.subr.bf16.mxu1 %v2353_v0 }
 0xa1f   : > { %2036 = vmatpush3.bf16.msra.mxu1 %v2143_v54 }
 0xa20   : > { %2037 = vmatprep.subr.bf16.mxu1 %v2353_v0 }
 0xa23   : > { %2038 = vmatpush3.bf16.msra.mxu1 %v2144_v55 }
 0xad6   : > { %v1466_v27 = vpop.f32.mrf.mxu1 }
 0xad7   : > { %v1472_v29 = vadd.f32 %v1466_v27, %v1313_v10 }
 0xad8   : > { %v2021_v30 = vpop.f32.mrf.mxu1 }
 0xad9   : > { %v1480_v31 = vadd.f32 %v1878_v28, %v1472_v29 }
 0xada   : > { %v1469_v33 = vpop.f32.mrf.mxu1 }
 0xadb   : > { %v1481_v34 = vadd.f32 %v1480_v31, %v2639_v14 }
 0xadc   : > { %v2022_v35 = vpop.f32.mrf.mxu1 }
 0xadd   : > { %v1482_v36 = vsel %vm715_vm1, %v1481_v34, 0.0 }
 0xade   : > { %1483 = vadd.xlane.f32.xlu1 %v1482_v36 }
 0xb67   : > { %v1484_v37 = vpop.xlane.xlu1 %1483 }
 0xb68   : > { %v1486_v38 = vmul.f32 0.03125, %v1484_v37 }
 0xb6a   : > { %v1487_v39 = vsub.f32 %v1481_v34, %v1486_v38 }
 0xb6c   : > { %v1488_v40 = vmul.f32 %v1487_v39, %v1487_v39 }
 0xb6e   : > { %v1489_v41 = vsel %vm715_vm1, %v1488_v40, 0.0 }
 0xb6f   : > { %1490 = vadd.xlane.f32.xlu1 %v1489_v41 }
 0xbf8   : > { %v1491_v44 = vpop.xlane.xlu1 %1490 }
 0xbf9   : > { %v1492_v45 = vmul.f32 0.03125, %v1491_v44 }
 0xbfb   : > { %v1493_v14 = vadd.f32 1e-12, %v1492_v45 }
 0xbfd   : > { %2161 = vrsqrt.f32 %v1493_v14 }
 0xc0a   : > { %v2162_v46 = vpop.eup %2161 }
 0xc0b   : > { %v1495_v25 = vmul.f32 %v2162_v46, %v1487_v39 }
 0xc0d   : > { %v1503_v49 = vmul.f32 %v1879_v47, %v1495_v25 }
 0xc0f   : > { %v1511_v50 = vadd.f32 %v1880_v48, %v1503_v49 }
 0xc11   : > { %v1512_v51 = vpack.c.bf16 %v1511_v50, %v1511_v50 }
 0xc13   : > { %2028 = vmatmul.mubr.msk.bf16.vlgmr.msra.gmra.mxu0 %vm715_vm1, %v1512_v51 }
 0xcd3   : > { %v1573_v57 = vpop.f32.mrf.mxu0 }
 0xcd4   : > { %v1574_v58 = vadd.f32 %v1881_v56, %v1573_v57 }
 0xcd5   : > { %v2029_v59 = vpop.f32.mrf.mxu0 }
 0xcd6   : > { %v1580_v60 = vmul.f32 0.70710677, %v1574_v58  ;;  %v1579_v1 = vmul.f32 0.5, %v1574_v58 }
 0xcd7   : > { %v1576_v61 = vpop.f32.mrf.mxu0 }
 0xcd8   : > { %2163 = verf.f32 %v1580_v60 }
 0xcd9   : > { %v2030_v62 = vpop.f32.mrf.mxu0 }
 0xce5   : > { %v2164_v63 = vpop.eup %2163 }
 0xce6   : > { %v1582_v2 = vadd.f32 1.0, %v2164_v63 }
 0xce8   : > { %v1583_v0 = vmul.f32 %v1582_v2, %v1579_v1 }
 0xcea   : > { %v1584_v3 = vpack.c.bf16 %v1583_v0, %v1583_v0 }
 0xcec   : > { %2040 = vmatmul.mubr.msk.bf16.vlgmr.msra.gmra.mxu1 %vm1624_vm4, %v1584_v3 }
 0xdac   : > { %v1662_v5 = vpop.f32.mrf.mxu1 }
 0xdad   : > { %v1663_v6 = vadd.f32 %v1885_v4, %v1662_v5 }
 0xdae   : > { %v2041_v7 = vpop.f32.mrf.mxu1 }
 0xdaf   : > { %v1668_v32 = vadd.f32 %v1663_v6, %v1511_v50 }
 0xdb0   : > { %v1665_v8 = vpop.f32.mrf.mxu1 }
 0xdb1   : > { %v1669_v9 = vsel %vm715_vm1, %v1668_v32, 0.0 }
 0xdb2   : > { %1670 = vadd.xlane.f32.xlu1 %v1669_v9  ;;  %v2042_v10 = vpop.f32.mrf.mxu1 }
 0xe3b   : > { %v1671_v11 = vpop.xlane.xlu1 %1670 }
 0xe3c   : > { %v1672_v12 = vmul.f32 0.03125, %v1671_v11 }
 0xe3e   : > { %v1673_v23 = vsub.f32 %v1668_v32, %v1672_v12 }
 0xe40   : > { %v1674_v13 = vmul.f32 %v1673_v23, %v1673_v23 }
 0xe42   : > { %v1675_v15 = vsel %vm715_vm1, %v1674_v13, 0.0 }
 0xe43   : > { %1676 = vadd.xlane.f32.xlu1 %v1675_v15 }
 0xecc   : > { %v1677_v16 = vpop.xlane.xlu1 %1676 }
 0xecd   : > { %v1678_v17 = vmul.f32 0.03125, %v1677_v16 }
 0xecf   : > { %v1679_v18 = vadd.f32 1e-12, %v1678_v17 }
 0xed1   : > { %2165 = vrsqrt.f32 %v1679_v18 }
 0xede   : > { %v2166_v19 = vpop.eup %2165 }
 0xedf   : > { %v1681_v21 = vmul.f32 %v2166_v19, %v1673_v23 }
 0xee1   : > { %v1689_v24 = vmul.f32 %v1891_v20, %v1681_v21 }
 0xee3   : > { %v1697_v26 = vadd.f32 %v1892_v22, %v1689_v24 }
 0xee5   : > { %1698 = vst.msk [vmem:[%s668_s27] sm:$0xff] %vm715_vm1, %v1697_v26 }
 0xee6   : > { %2286 = shalt.err (!%p2283_p13)
}
 0xee7   : > { %s2287_s2 = scalar_lea.hbm %s1711_s8, 128  ;;  %s2291_s6 = scalar_lea.hbm %s2891_s26, 256 }
 0xee8   : > { %p2288_p1 = scmp.ne.s32.totalorder %s1711_s8, %s2287_s2  ;;  %p2292_p11 = scmp.lt.s32.totalorder %s1711_s8, %s2891_s26 }
 0xee9   : > { %p2293_p2 = scmp.lt.s32.totalorder %s2291_s6, %s2287_s2 }
 0xeea   : > { %p2289_p8 = pnand %p2288_p1, %p2892_p12 }
 0xeeb   : > { %p2294_p4 = por %p2293_p2, %p2292_p11 }
 0xeec   : > { %p2290_p10 = pneg %p2289_p8 }
 0xeee   : > { %p2295_p6 = pnand %p2294_p4, %p2290_p10 }
 0xef0   : > { %2298 = shalt.err (!%p2295_p6)
}
 0xef1   : > { %2057 = dma.vmem_to_hbm [thread:$0]  (%p2892_p12), %s1714_s29, 128, %s1711_s8, %s1700_s21  }
 0xef2 PF: > { %s2893_s27 = sld [smem:[#allocation15_spill]] }
 0xef3   : > { %s2894_s30 = sld [smem:[#allocation18_spill]] }
 0xef4   : > { %s2895_s1 = sld [smem:[#allocation17_spill]] }
 0xef8   : > { %s1725_s17 = sand.u32 1, %s2893_s27  }
 0xef9   : > { %p2896_p0 = scmp.ne.s32.totalorder %s2894_s30, 0  ;;  %s1726_s23 = scalar_lea.sflag [#allocation4], %s1725_s17 }
 0xefa   : > { %p2897_p5 = scmp.ge.s32.totalorder %s2895_s1, 2 }
 0xefc   : > { %p2074_p3 = pnand %p2897_p5, %p2896_p0 }
 0xefe   : > { %p2075_p7 = pneg %p2074_p3 }
 0xf00   : > { %2328 = dma.done.wait (%p2075_p7), %s1726_s23, 128  }
 0xf01   : > { %2330 = vsyncadd (%p2075_p7), %s1726_s23, 4294967168  ;;  %s2898_s30 = sld [smem:[#allocation19_spill]]  ;;  %s2901_s27 = smov %s2337_s28 }
 0xf02   : > { %s2899_s18 = sld [smem:[#allocation16_spill]] }
 0xf03   : > { %s2900_s29 = sld [smem:[#allocation20_spill]] }
 0xf07   : > { %p33_p9 = scmp.ge.s32.totalorder %s2898_s30, 4  }
 0xf08   : > { %s2902_s28 = smov %s2899_s18 }
 0xf09   :  { %35 = sbr.rel (!%p33_p9) target bundleno = 16 (0x10), region = 158 }
 0xf0e   :  { %1731 = vsyncpa [#allocation3], 1 }
 0xf0f   :  { %1733 = vsyncpa [#allocation3 + $0x1], 1 }
 0xf10   :  { %1734 = vsyncpa [#allocation6], 1 }
 0xf11   :  { %1735 = vsyncpa [#allocation9], 1 }
 0xf12   :  { %1736 = vsyncpa [#allocation4], 1 }
 0xf13   :  { %1738 = vsyncpa [#allocation4 + $0x1], 1 }

</bundles_post_ra>
